<compile_context>
chip_gen: v7x
topology: tpu7x:2x2x1
jax: 0.10.0
libtpu: 0.0.40
codegen_flags: <defaults>
</compile_context>

<pallas_src>
import jax
import jax.numpy as jnp
from jax.experimental import pallas as pl
from jax.experimental.pallas import tpu as pltpu


# ----------------------------------------------------------------------------
# Fused Pallas kernel
# ----------------------------------------------------------------------------
def _make_fused_kernel(T, Bp, H):
    """Build the fused forward kernel for static (T, Bp, H)."""
    f32 = jnp.float32

    def kernel(x0_ref, wih0_ref, whh0_ref, b0_ref,
               wih1_ref, whh1_ref, b1_ref, fcw_ref, fcb_ref,
               out_ref, h0f_scr, h0b_scr):
        # x0_ref:   (T*Bp, D0)   time-major, batch-padded, flattened input
        # wih{L}:   (2, Din, 4H) [fwd, bwd] W_ih^T      (gate order i,f,g,o)
        # whh{L}:   (2, H, 4H)   [fwd, bwd] W_hh^T
        # b{L}:     (2, 1, 4H)   [fwd, bwd] b_ih + b_hh
        # fcw_ref:  (2H, Vpad)   FC weight^T, lane-padded
        # fcb_ref:  (1, Vpad)
        # out_ref:  (Bp, Vpad)
        # h0f_scr / h0b_scr: (T*Bp, H) VMEM scratch: layer-0 fwd / bwd outputs

        def cell(gates, c_prev):
            # gates: (Bp, 4H) pre-activations, PyTorch gate order (i, f, g, o)
            sg = jax.nn.sigmoid(gates)               # full-width EUP pushes
            tg = jnp.tanh(gates)
            i_g = sg[:, 0 * H:1 * H]
            f_g = sg[:, 1 * H:2 * H]
            g_g = tg[:, 2 * H:3 * H]
            o_g = sg[:, 3 * H:4 * H]
            c_new = f_g * c_prev + i_g * g_g
            h_new = o_g * jnp.tanh(c_new)
            return h_new, c_new

        def run_dir(gx_all, whh, reverse, out_scr=None):
            # gx_all: (T*Bp, 4H) hoisted x-gates (bias already included).
            h = jnp.zeros((Bp, H), f32)
            c = jnp.zeros((Bp, H), f32)
            ts = range(T - 1, -1, -1) if reverse else range(T)
            for t in ts:                              # static unroll, T small
                g = gx_all[t * Bp:(t + 1) * Bp, :] + jnp.dot(
                    h, whh, preferred_element_type=f32)
                h, c = cell(g, c)
                if out_scr is not None:
                    out_scr[t * Bp:(t + 1) * Bp, :] = h   # aligned sublanes
            return h

        x0 = x0_ref[...]                                          # (T*Bp, D0)

        # ----------------------- layer 0 (bidirectional) --------------------
        gx0_f = jnp.dot(x0, wih0_ref[0], preferred_element_type=f32) + b0_ref[0]
        gx0_b = jnp.dot(x0, wih0_ref[1], preferred_element_type=f32) + b0_ref[1]
        run_dir(gx0_f, whh0_ref[0], reverse=False, out_scr=h0f_scr)
        run_dir(gx0_b, whh0_ref[1], reverse=True, out_scr=h0b_scr)

        x1f = h0f_scr[...]                                        # (T*Bp, H)
        x1b = h0b_scr[...]                                        # (T*Bp, H)

        # ----------------------- layer 1 (bidirectional) --------------------
        # Forward direction: hoisted x-gates; W_ih rows split into the halves
        # that multiply the fwd / bwd parts of the layer-0 output (no concat).
        w1f = wih1_ref[0]                                         # (2H, 4H)
        gx1_f = (jnp.dot(x1f, w1f[0:H, :], preferred_element_type=f32)
                 + jnp.dot(x1b, w1f[H:2 * H, :], preferred_element_type=f32)
                 + b1_ref[0])
        h1_fwd = run_dir(gx1_f, whh1_ref[0], reverse=False)       # final fwd h

        # Backward direction: only its t = T-1 output reaches the FC head, and
        # that is the FIRST backward step (zero initial state) -> one cell.
        w1b = wih1_ref[1]
        x1f_last = x1f[(T - 1) * Bp:T * Bp, :]
        x1b_last = x1b[(T - 1) * Bp:T * Bp, :]
        g1b = (jnp.dot(x1f_last, w1b[0:H, :], preferred_element_type=f32)
               + jnp.dot(x1b_last, w1b[H:2 * H, :], preferred_element_type=f32)
               + b1_ref[1])
        h1_bwd, _ = cell(g1b, jnp.zeros((Bp, H), f32))

        # ------------------------------ FC head -----------------------------
        # out = [h1_fwd, h1_bwd] @ fcw + fcb, written concat-free as a sum of
        # two dots against the aligned row-halves of fcw.
        fcw = fcw_ref[...]                                        # (2H, Vpad)
        out_ref[...] = (jnp.dot(h1_fwd, fcw[0:H, :], preferred_element_type=f32)
                        + jnp.dot(h1_bwd, fcw[H:2 * H, :],
                                  preferred_element_type=f32)
                        + fcb_ref[...])

    return kernel


def _fused_forward_call(x0, wih0, whh0, b0, wih1, whh1, b1, fcw, fcb,
                        *, T, Bp, H, Vpad):
    kernel = _make_fused_kernel(T, Bp, H)
    return pl.pallas_call(
        kernel,
        out_shape=jax.ShapeDtypeStruct((Bp, Vpad), jnp.float32),
        scratch_shapes=[pltpu.VMEM((T * Bp, H), jnp.float32),
                        pltpu.VMEM((T * Bp, H), jnp.float32)],
    )(x0, wih0, whh0, b0, wih1, whh1, b1, fcw, fcb)


# ----------------------------------------------------------------------------
# Model wrapper
# ----------------------------------------------------------------------------
def init_params(key, vocab_size, embed_size, n_melody, hidden):
    """Deterministic parameter init mirroring the module's shapes."""
    params = {}
    k = key

    def nxt():
        nonlocal k
        k, sub = jax.random.split(k)
        return sub

    # frozen word2vec embedding matrix (vocab, embed); row 0 = padding
    emb = jax.random.normal(nxt(), (vocab_size, embed_size), jnp.float32)
    emb = emb.at[0].set(0.0)
    params["embedding"] = emb

    bound = 1.0 / jnp.sqrt(hidden)
    in_sizes = [embed_size + n_melody, 2 * hidden]    # layer 0, layer 1 inputs
    layers = []
    for lin in in_sizes:
        layer = {}
        for suf, d in (("", lin), ("_r", lin)):
            layer["w_ih" + suf] = jax.random.uniform(
                nxt(), (4 * hidden, d), jnp.float32, -bound, bound)
            layer["w_hh" + suf] = jax.random.uniform(
                nxt(), (4 * hidden, hidden), jnp.float32, -bound, bound)
            layer["b_ih" + suf] = jax.random.uniform(
                nxt(), (4 * hidden,), jnp.float32, -bound, bound)
            layer["b_hh" + suf] = jax.random.uniform(
                nxt(), (4 * hidden,), jnp.float32, -bound, bound)
        layers.append(layer)
    params["lstm"] = layers

    fc_bound = 1.0 / jnp.sqrt(2 * hidden)
    params["fc_w"] = jax.random.uniform(
        nxt(), (vocab_size, 2 * hidden), jnp.float32, -fc_bound, fc_bound)
    params["fc_b"] = jax.random.uniform(
        nxt(), (vocab_size,), jnp.float32, -fc_bound, fc_bound)
    return params


@jax.jit
def lstm_lyrics_melodies_forward(params, lyrics_ids, melodies):
    """lyrics_ids: (B, T) int32, melodies: (B, T, n_melody) -> (B, vocab)."""
    B, T = lyrics_ids.shape

    # Embedding gather stays in plain JAX (glue); concat features.
    embedded = jnp.take(params["embedding"], lyrics_ids, axis=0).astype(jnp.float32)
    if melodies.ndim == 2:                       # mirrors the batch==1 unsqueeze
        melodies = melodies[None]
    feats = jnp.concatenate([embedded, melodies.astype(jnp.float32)], axis=2)
    D0 = feats.shape[-1]

    l0, l1 = params["lstm"]
    H = l0["w_hh"].shape[1]

    # Pad batch to a sublane multiple so all in-kernel slices are aligned.
    Bp = max(8, ((B + 7) // 8) * 8)

    # batch_first (B, T, D) -> time-major, batch-padded, flattened (T*Bp, D).
    x_t = jnp.transpose(feats, (1, 0, 2))                        # (T, B, D0)
    x_t = jnp.pad(x_t, ((0, 0), (0, Bp - B), (0, 0)))            # (T, Bp, D0)
    x0 = x_t.reshape(T * Bp, D0)

    def pack(layer):
        wih = jnp.stack([layer["w_ih"].T, layer["w_ih_r"].T]).astype(jnp.float32)
        whh = jnp.stack([layer["w_hh"].T, layer["w_hh_r"].T]).astype(jnp.float32)
        b = jnp.stack([(layer["b_ih"] + layer["b_hh"])[None, :],
                       (layer["b_ih_r"] + layer["b_hh_r"])[None, :]]
                      ).astype(jnp.float32)
        return wih, whh, b

    wih0, whh0, b0 = pack(l0)
    wih1, whh1, b1 = pack(l1)

    # Lane-dense FC head: pad V up to a multiple of 128.
    V = params["fc_w"].shape[0]
    Vpad = ((V + 127) // 128) * 128
    fcw = jnp.zeros((2 * H, Vpad), jnp.float32).at[:, :V].set(
        params["fc_w"].T.astype(jnp.float32))
    fcb = jnp.zeros((1, Vpad), jnp.float32).at[:, :V].set(
        params["fc_b"].astype(jnp.float32))

    logits_pad = _fused_forward_call(x0, wih0, whh0, b0, wih1, whh1, b1,
                                     fcw, fcb, T=T, Bp=Bp, H=H, Vpad=Vpad)
    # dropout(p=0.0) is the identity (inference semantics)
    return logits_pad[:B, :V]


# ----------------------------------------------------------------------------
# Pure-JAX reference (for numerical validation of the fused kernel)
# ----------------------------------------------------------------------------
def _reference_forward(params, lyrics_ids, melodies):
    hp = jax.lax.Precision.HIGHEST
    emb = jnp.take(params["embedding"], lyrics_ids, axis=0).astype(jnp.float32)
    if melodies.ndim == 2:
        melodies = melodies[None]
    feats = jnp.concatenate([emb, melodies.astype(jnp.float32)], axis=2)
    B, T, _ = feats.shape
    H = params["lstm"][0]["w_hh"].shape[1]

    def direction(x_btd, w_ih, w_hh, b_ih, b_hh, reverse):
        h = jnp.zeros((B, H), jnp.float32)
        c = jnp.zeros((B, H), jnp.float32)
        outs = [None] * T
        ts = range(T - 1, -1, -1) if reverse else range(T)
        for t in ts:
            g = (jnp.dot(x_btd[:, t, :], w_ih.T, precision=hp)
                 + jnp.dot(h, w_hh.T, precision=hp) + b_ih + b_hh)
            i = jax.nn.sigmoid(g[:, :H])
            f = jax.nn.sigmoid(g[:, H:2 * H])
            gg = jnp.tanh(g[:, 2 * H:3 * H])
            o = jax.nn.sigmoid(g[:, 3 * H:])
            c = f * c + i * gg
            h = o * jnp.tanh(c)
            outs[t] = h
        return jnp.stack(outs, axis=1)            # (B, T, H)

    x = feats
    for lp in params["lstm"]:
        hf = direction(x, lp["w_ih"], lp["w_hh"], lp["b_ih"], lp["b_hh"], False)
        hb = direction(x, lp["w_ih_r"], lp["w_hh_r"], lp["b_ih_r"], lp["b_hh_r"], True)
        x = jnp.concatenate([hf, hb], axis=-1)    # (B, T, 2H)
    last = x[:, -1, :]
    return jnp.dot(last, params["fc_w"].T, precision=hp) + params["fc_b"]


# ----------------------------------------------------------------------------
# Demo
# ----------------------------------------------------------------------------
if __name__ == "__main__":
    vocab_size = 50
    embed_size = 16
    n_melody = 16
    hidden = 32
    batch = 2
    seq = 8

    key = jax.random.PRNGKey(0)
    params = init_params(key, vocab_size, embed_size, n_melody, hidden)

    k1, k2 = jax.random.split(jax.random.PRNGKey(0))
    lyrics_ids = jax.random.randint(k1, (batch, seq), 0, vocab_size, jnp.int32)
    melodies = jax.random.normal(k2, (batch, seq, n_melody), jnp.float32)

    logits = lstm_lyrics_melodies_forward(params, lyrics_ids, melodies)
    jax.block_until_ready(logits)
    assert logits.shape == (batch, vocab_size)
    assert bool(jnp.all(jnp.isfinite(logits)))

    ref = _reference_forward(params, lyrics_ids, melodies)
    assert bool(jnp.allclose(logits, ref, rtol=1e-2, atol=1e-2)), (
        "mismatch vs pure-JAX reference: max abs diff = "
        f"{float(jnp.max(jnp.abs(logits - ref)))}")

    print("KERNEL_OK")
</pallas_src>

<mosaic_0001>
module attributes {stable_mosaic.version = 11 : i64} {
  func.func @kernel(%arg0: memref<64x32xf32, #tpu.memory_space<vmem>>, %arg1: memref<2x32x128xf32, #tpu.memory_space<vmem>>, %arg2: memref<2x32x128xf32, #tpu.memory_space<vmem>>, %arg3: memref<2x1x128xf32, #tpu.memory_space<vmem>>, %arg4: memref<2x64x128xf32, #tpu.memory_space<vmem>>, %arg5: memref<2x32x128xf32, #tpu.memory_space<vmem>>, %arg6: memref<2x1x128xf32, #tpu.memory_space<vmem>>, %arg7: memref<64x128xf32, #tpu.memory_space<vmem>>, %arg8: memref<1x128xf32, #tpu.memory_space<vmem>>, %arg9: memref<8x128xf32, #tpu.memory_space<vmem>>, %arg10: memref<64x32xf32, #tpu.memory_space<vmem>>, %arg11: memref<64x32xf32, #tpu.memory_space<vmem>>) attributes {dimension_semantics = [], scalar_prefetch = 0 : i64, scratch_operands = 2 : i64, tpu.core_type = #tpu.core_type<tc>} {
    %c0 = arith.constant 0 : index
    %c0_0 = arith.constant 0 : index
    %0 = vector.load %arg0[%c0, %c0_0] : memref<64x32xf32, #tpu.memory_space<vmem>>, vector<64x32xf32>
    %c0_1 = arith.constant 0 : index
    %c0_2 = arith.constant 0 : index
    %c0_3 = arith.constant 0 : index
    %1 = vector.load %arg1[%c0_1, %c0_2, %c0_3] : memref<2x32x128xf32, #tpu.memory_space<vmem>>, vector<1x32x128xf32>
    %2 = vector.shape_cast %1 : vector<1x32x128xf32> to vector<32x128xf32>
    %cst = arith.constant dense<0.000000e+00> : vector<64x128xf32>
    %3 = tpu.matmul %0, %2, %cst {dimension_numbers = #tpu.dot_dimension_numbers<[1], [0], [0], [1], [0, 0, 1, 1], [], []>} : vector<64x32xf32>, vector<32x128xf32>, vector<64x128xf32> -> vector<64x128xf32>
    %c0_4 = arith.constant 0 : index
    %c0_5 = arith.constant 0 : index
    %c0_6 = arith.constant 0 : index
    %4 = vector.load %arg3[%c0_4, %c0_5, %c0_6] : memref<2x1x128xf32, #tpu.memory_space<vmem>>, vector<1x1x128xf32>
    %5 = vector.shape_cast %4 : vector<1x1x128xf32> to vector<1x128xf32>
    %6 = vector.broadcast %5 : vector<1x128xf32> to vector<64x128xf32>
    %7 = arith.addf %3, %6 : vector<64x128xf32>
    %c1 = arith.constant 1 : index
    %c0_7 = arith.constant 0 : index
    %c0_8 = arith.constant 0 : index
    %8 = vector.load %arg1[%c1, %c0_7, %c0_8] : memref<2x32x128xf32, #tpu.memory_space<vmem>>, vector<1x32x128xf32>
    %9 = vector.shape_cast %8 : vector<1x32x128xf32> to vector<32x128xf32>
    %cst_9 = arith.constant dense<0.000000e+00> : vector<64x128xf32>
    %10 = tpu.matmul %0, %9, %cst_9 {dimension_numbers = #tpu.dot_dimension_numbers<[1], [0], [0], [1], [0, 0, 1, 1], [], []>} : vector<64x32xf32>, vector<32x128xf32>, vector<64x128xf32> -> vector<64x128xf32>
    %c1_10 = arith.constant 1 : index
    %c0_11 = arith.constant 0 : index
    %c0_12 = arith.constant 0 : index
    %11 = vector.load %arg3[%c1_10, %c0_11, %c0_12] : memref<2x1x128xf32, #tpu.memory_space<vmem>>, vector<1x1x128xf32>
    %12 = vector.shape_cast %11 : vector<1x1x128xf32> to vector<1x128xf32>
    %13 = vector.broadcast %12 : vector<1x128xf32> to vector<64x128xf32>
    %14 = arith.addf %10, %13 : vector<64x128xf32>
    %c0_13 = arith.constant 0 : index
    %c0_14 = arith.constant 0 : index
    %c0_15 = arith.constant 0 : index
    %15 = vector.load %arg2[%c0_13, %c0_14, %c0_15] : memref<2x32x128xf32, #tpu.memory_space<vmem>>, vector<1x32x128xf32>
    %16 = vector.shape_cast %15 : vector<1x32x128xf32> to vector<32x128xf32>
    %cst_16 = arith.constant 0.000000e+00 : f32
    %17 = vector.broadcast %cst_16 : f32 to vector<8x32xf32>
    %cst_17 = arith.constant 0.000000e+00 : f32
    %18 = vector.broadcast %cst_17 : f32 to vector<8x32xf32>
    %19 = vector.extract_strided_slice %7 {offsets = [0, 0], sizes = [8, 128], strides = [1, 1]} : vector<64x128xf32> to vector<8x128xf32>
    %cst_18 = arith.constant dense<0.000000e+00> : vector<8x128xf32>
    %20 = tpu.matmul %17, %16, %cst_18 {dimension_numbers = #tpu.dot_dimension_numbers<[1], [0], [0], [1], [0, 0, 1, 1], [], []>} : vector<8x32xf32>, vector<32x128xf32>, vector<8x128xf32> -> vector<8x128xf32>
    %21 = arith.addf %19, %20 : vector<8x128xf32>
    %22 = arith.negf %21 : vector<8x128xf32>
    %23 = math.exp %22 : vector<8x128xf32>
    %cst_19 = arith.constant 1.000000e+00 : f32
    %24 = vector.broadcast %cst_19 : f32 to vector<8x128xf32>
    %25 = arith.addf %24, %23 : vector<8x128xf32>
    %26 = arith.divf %24, %25 : vector<8x128xf32>
    %27 = math.tanh %21 : vector<8x128xf32>
    %28 = vector.extract_strided_slice %26 {offsets = [0, 0], sizes = [8, 32], strides = [1, 1]} : vector<8x128xf32> to vector<8x32xf32>
    %29 = vector.extract_strided_slice %26 {offsets = [0, 32], sizes = [8, 32], strides = [1, 1]} : vector<8x128xf32> to vector<8x32xf32>
    %30 = vector.extract_strided_slice %27 {offsets = [0, 64], sizes = [8, 32], strides = [1, 1]} : vector<8x128xf32> to vector<8x32xf32>
    %31 = vector.extract_strided_slice %26 {offsets = [0, 96], sizes = [8, 32], strides = [1, 1]} : vector<8x128xf32> to vector<8x32xf32>
    %32 = arith.mulf %29, %18 : vector<8x32xf32>
    %33 = arith.mulf %28, %30 : vector<8x32xf32>
    %34 = arith.addf %32, %33 : vector<8x32xf32>
    %35 = math.tanh %34 : vector<8x32xf32>
    %36 = arith.mulf %31, %35 : vector<8x32xf32>
    %c0_20 = arith.constant 0 : index
    %c0_21 = arith.constant 0 : index
    %37 = vector.load %arg10[%c0_20, %c0_21] : memref<64x32xf32, #tpu.memory_space<vmem>>, vector<8x32xf32>
    tpu.vector_store %arg10[%c0_20, %c0_21], %36 {strides = array<i32>} : memref<64x32xf32, #tpu.memory_space<vmem>>, vector<8x32xf32>,
    %38 = vector.extract_strided_slice %7 {offsets = [8, 0], sizes = [8, 128], strides = [1, 1]} : vector<64x128xf32> to vector<8x128xf32>
    %cst_22 = arith.constant dense<0.000000e+00> : vector<8x128xf32>
    %39 = tpu.matmul %36, %16, %cst_22 {dimension_numbers = #tpu.dot_dimension_numbers<[1], [0], [0], [1], [0, 0, 1, 1], [], []>} : vector<8x32xf32>, vector<32x128xf32>, vector<8x128xf32> -> vector<8x128xf32>
    %40 = arith.addf %38, %39 : vector<8x128xf32>
    %41 = arith.negf %40 : vector<8x128xf32>
    %42 = math.exp %41 : vector<8x128xf32>
    %cst_23 = arith.constant 1.000000e+00 : f32
    %43 = vector.broadcast %cst_23 : f32 to vector<8x128xf32>
    %44 = arith.addf %43, %42 : vector<8x128xf32>
    %45 = arith.divf %43, %44 : vector<8x128xf32>
    %46 = math.tanh %40 : vector<8x128xf32>
    %47 = vector.extract_strided_slice %45 {offsets = [0, 0], sizes = [8, 32], strides = [1, 1]} : vector<8x128xf32> to vector<8x32xf32>
    %48 = vector.extract_strided_slice %45 {offsets = [0, 32], sizes = [8, 32], strides = [1, 1]} : vector<8x128xf32> to vector<8x32xf32>
    %49 = vector.extract_strided_slice %46 {offsets = [0, 64], sizes = [8, 32], strides = [1, 1]} : vector<8x128xf32> to vector<8x32xf32>
    %50 = vector.extract_strided_slice %45 {offsets = [0, 96], sizes = [8, 32], strides = [1, 1]} : vector<8x128xf32> to vector<8x32xf32>
    %51 = arith.mulf %48, %34 : vector<8x32xf32>
    %52 = arith.mulf %47, %49 : vector<8x32xf32>
    %53 = arith.addf %51, %52 : vector<8x32xf32>
    %54 = math.tanh %53 : vector<8x32xf32>
    %55 = arith.mulf %50, %54 : vector<8x32xf32>
    %c8 = arith.constant 8 : index
    %c0_24 = arith.constant 0 : index
    %56 = vector.load %arg10[%c8, %c0_24] : memref<64x32xf32, #tpu.memory_space<vmem>>, vector<8x32xf32>
    tpu.vector_store %arg10[%c8, %c0_24], %55 {strides = array<i32>} : memref<64x32xf32, #tpu.memory_space<vmem>>, vector<8x32xf32>,
    %57 = vector.extract_strided_slice %7 {offsets = [16, 0], sizes = [8, 128], strides = [1, 1]} : vector<64x128xf32> to vector<8x128xf32>
    %cst_25 = arith.constant dense<0.000000e+00> : vector<8x128xf32>
    %58 = tpu.matmul %55, %16, %cst_25 {dimension_numbers = #tpu.dot_dimension_numbers<[1], [0], [0], [1], [0, 0, 1, 1], [], []>} : vector<8x32xf32>, vector<32x128xf32>, vector<8x128xf32> -> vector<8x128xf32>
    %59 = arith.addf %57, %58 : vector<8x128xf32>
    %60 = arith.negf %59 : vector<8x128xf32>
    %61 = math.exp %60 : vector<8x128xf32>
    %cst_26 = arith.constant 1.000000e+00 : f32
    %62 = vector.broadcast %cst_26 : f32 to vector<8x128xf32>
    %63 = arith.addf %62, %61 : vector<8x128xf32>
    %64 = arith.divf %62, %63 : vector<8x128xf32>
    %65 = math.tanh %59 : vector<8x128xf32>
    %66 = vector.extract_strided_slice %64 {offsets = [0, 0], sizes = [8, 32], strides = [1, 1]} : vector<8x128xf32> to vector<8x32xf32>
    %67 = vector.extract_strided_slice %64 {offsets = [0, 32], sizes = [8, 32], strides = [1, 1]} : vector<8x128xf32> to vector<8x32xf32>
    %68 = vector.extract_strided_slice %65 {offsets = [0, 64], sizes = [8, 32], strides = [1, 1]} : vector<8x128xf32> to vector<8x32xf32>
    %69 = vector.extract_strided_slice %64 {offsets = [0, 96], sizes = [8, 32], strides = [1, 1]} : vector<8x128xf32> to vector<8x32xf32>
    %70 = arith.mulf %67, %53 : vector<8x32xf32>
    %71 = arith.mulf %66, %68 : vector<8x32xf32>
    %72 = arith.addf %70, %71 : vector<8x32xf32>
    %73 = math.tanh %72 : vector<8x32xf32>
    %74 = arith.mulf %69, %73 : vector<8x32xf32>
    %c16 = arith.constant 16 : index
    %c0_27 = arith.constant 0 : index
    %75 = vector.load %arg10[%c16, %c0_27] : memref<64x32xf32, #tpu.memory_space<vmem>>, vector<8x32xf32>
    tpu.vector_store %arg10[%c16, %c0_27], %74 {strides = array<i32>} : memref<64x32xf32, #tpu.memory_space<vmem>>, vector<8x32xf32>,
    %76 = vector.extract_strided_slice %7 {offsets = [24, 0], sizes = [8, 128], strides = [1, 1]} : vector<64x128xf32> to vector<8x128xf32>
    %cst_28 = arith.constant dense<0.000000e+00> : vector<8x128xf32>
    %77 = tpu.matmul %74, %16, %cst_28 {dimension_numbers = #tpu.dot_dimension_numbers<[1], [0], [0], [1], [0, 0, 1, 1], [], []>} : vector<8x32xf32>, vector<32x128xf32>, vector<8x128xf32> -> vector<8x128xf32>
    %78 = arith.addf %76, %77 : vector<8x128xf32>
    %79 = arith.negf %78 : vector<8x128xf32>
    %80 = math.exp %79 : vector<8x128xf32>
    %cst_29 = arith.constant 1.000000e+00 : f32
    %81 = vector.broadcast %cst_29 : f32 to vector<8x128xf32>
    %82 = arith.addf %81, %80 : vector<8x128xf32>
    %83 = arith.divf %81, %82 : vector<8x128xf32>
    %84 = math.tanh %78 : vector<8x128xf32>
    %85 = vector.extract_strided_slice %83 {offsets = [0, 0], sizes = [8, 32], strides = [1, 1]} : vector<8x128xf32> to vector<8x32xf32>
    %86 = vector.extract_strided_slice %83 {offsets = [0, 32], sizes = [8, 32], strides = [1, 1]} : vector<8x128xf32> to vector<8x32xf32>
    %87 = vector.extract_strided_slice %84 {offsets = [0, 64], sizes = [8, 32], strides = [1, 1]} : vector<8x128xf32> to vector<8x32xf32>
    %88 = vector.extract_strided_slice %83 {offsets = [0, 96], sizes = [8, 32], strides = [1, 1]} : vector<8x128xf32> to vector<8x32xf32>
    %89 = arith.mulf %86, %72 : vector<8x32xf32>
    %90 = arith.mulf %85, %87 : vector<8x32xf32>
    %91 = arith.addf %89, %90 : vector<8x32xf32>
    %92 = math.tanh %91 : vector<8x32xf32>
    %93 = arith.mulf %88, %92 : vector<8x32xf32>
    %c24 = arith.constant 24 : index
    %c0_30 = arith.constant 0 : index
    %94 = vector.load %arg10[%c24, %c0_30] : memref<64x32xf32, #tpu.memory_space<vmem>>, vector<8x32xf32>
    tpu.vector_store %arg10[%c24, %c0_30], %93 {strides = array<i32>} : memref<64x32xf32, #tpu.memory_space<vmem>>, vector<8x32xf32>,
    %95 = vector.extract_strided_slice %7 {offsets = [32, 0], sizes = [8, 128], strides = [1, 1]} : vector<64x128xf32> to vector<8x128xf32>
    %cst_31 = arith.constant dense<0.000000e+00> : vector<8x128xf32>
    %96 = tpu.matmul %93, %16, %cst_31 {dimension_numbers = #tpu.dot_dimension_numbers<[1], [0], [0], [1], [0, 0, 1, 1], [], []>} : vector<8x32xf32>, vector<32x128xf32>, vector<8x128xf32> -> vector<8x128xf32>
    %97 = arith.addf %95, %96 : vector<8x128xf32>
    %98 = arith.negf %97 : vector<8x128xf32>
    %99 = math.exp %98 : vector<8x128xf32>
    %cst_32 = arith.constant 1.000000e+00 : f32
    %100 = vector.broadcast %cst_32 : f32 to vector<8x128xf32>
    %101 = arith.addf %100, %99 : vector<8x128xf32>
    %102 = arith.divf %100, %101 : vector<8x128xf32>
    %103 = math.tanh %97 : vector<8x128xf32>
    %104 = vector.extract_strided_slice %102 {offsets = [0, 0], sizes = [8, 32], strides = [1, 1]} : vector<8x128xf32> to vector<8x32xf32>
    %105 = vector.extract_strided_slice %102 {offsets = [0, 32], sizes = [8, 32], strides = [1, 1]} : vector<8x128xf32> to vector<8x32xf32>
    %106 = vector.extract_strided_slice %103 {offsets = [0, 64], sizes = [8, 32], strides = [1, 1]} : vector<8x128xf32> to vector<8x32xf32>
    %107 = vector.extract_strided_slice %102 {offsets = [0, 96], sizes = [8, 32], strides = [1, 1]} : vector<8x128xf32> to vector<8x32xf32>
    %108 = arith.mulf %105, %91 : vector<8x32xf32>
    %109 = arith.mulf %104, %106 : vector<8x32xf32>
    %110 = arith.addf %108, %109 : vector<8x32xf32>
    %111 = math.tanh %110 : vector<8x32xf32>
    %112 = arith.mulf %107, %111 : vector<8x32xf32>
    %c32 = arith.constant 32 : index
    %c0_33 = arith.constant 0 : index
    %113 = vector.load %arg10[%c32, %c0_33] : memref<64x32xf32, #tpu.memory_space<vmem>>, vector<8x32xf32>
    tpu.vector_store %arg10[%c32, %c0_33], %112 {strides = array<i32>} : memref<64x32xf32, #tpu.memory_space<vmem>>, vector<8x32xf32>,
    %114 = vector.extract_strided_slice %7 {offsets = [40, 0], sizes = [8, 128], strides = [1, 1]} : vector<64x128xf32> to vector<8x128xf32>
    %cst_34 = arith.constant dense<0.000000e+00> : vector<8x128xf32>
    %115 = tpu.matmul %112, %16, %cst_34 {dimension_numbers = #tpu.dot_dimension_numbers<[1], [0], [0], [1], [0, 0, 1, 1], [], []>} : vector<8x32xf32>, vector<32x128xf32>, vector<8x128xf32> -> vector<8x128xf32>
    %116 = arith.addf %114, %115 : vector<8x128xf32>
    %117 = arith.negf %116 : vector<8x128xf32>
    %118 = math.exp %117 : vector<8x128xf32>
    %cst_35 = arith.constant 1.000000e+00 : f32
    %119 = vector.broadcast %cst_35 : f32 to vector<8x128xf32>
    %120 = arith.addf %119, %118 : vector<8x128xf32>
    %121 = arith.divf %119, %120 : vector<8x128xf32>
    %122 = math.tanh %116 : vector<8x128xf32>
    %123 = vector.extract_strided_slice %121 {offsets = [0, 0], sizes = [8, 32], strides = [1, 1]} : vector<8x128xf32> to vector<8x32xf32>
    %124 = vector.extract_strided_slice %121 {offsets = [0, 32], sizes = [8, 32], strides = [1, 1]} : vector<8x128xf32> to vector<8x32xf32>
    %125 = vector.extract_strided_slice %122 {offsets = [0, 64], sizes = [8, 32], strides = [1, 1]} : vector<8x128xf32> to vector<8x32xf32>
    %126 = vector.extract_strided_slice %121 {offsets = [0, 96], sizes = [8, 32], strides = [1, 1]} : vector<8x128xf32> to vector<8x32xf32>
    %127 = arith.mulf %124, %110 : vector<8x32xf32>
    %128 = arith.mulf %123, %125 : vector<8x32xf32>
    %129 = arith.addf %127, %128 : vector<8x32xf32>
    %130 = math.tanh %129 : vector<8x32xf32>
    %131 = arith.mulf %126, %130 : vector<8x32xf32>
    %c40 = arith.constant 40 : index
    %c0_36 = arith.constant 0 : index
    %132 = vector.load %arg10[%c40, %c0_36] : memref<64x32xf32, #tpu.memory_space<vmem>>, vector<8x32xf32>
    tpu.vector_store %arg10[%c40, %c0_36], %131 {strides = array<i32>} : memref<64x32xf32, #tpu.memory_space<vmem>>, vector<8x32xf32>,
    %133 = vector.extract_strided_slice %7 {offsets = [48, 0], sizes = [8, 128], strides = [1, 1]} : vector<64x128xf32> to vector<8x128xf32>
    %cst_37 = arith.constant dense<0.000000e+00> : vector<8x128xf32>
    %134 = tpu.matmul %131, %16, %cst_37 {dimension_numbers = #tpu.dot_dimension_numbers<[1], [0], [0], [1], [0, 0, 1, 1], [], []>} : vector<8x32xf32>, vector<32x128xf32>, vector<8x128xf32> -> vector<8x128xf32>
    %135 = arith.addf %133, %134 : vector<8x128xf32>
    %136 = arith.negf %135 : vector<8x128xf32>
    %137 = math.exp %136 : vector<8x128xf32>
    %cst_38 = arith.constant 1.000000e+00 : f32
    %138 = vector.broadcast %cst_38 : f32 to vector<8x128xf32>
    %139 = arith.addf %138, %137 : vector<8x128xf32>
    %140 = arith.divf %138, %139 : vector<8x128xf32>
    %141 = math.tanh %135 : vector<8x128xf32>
    %142 = vector.extract_strided_slice %140 {offsets = [0, 0], sizes = [8, 32], strides = [1, 1]} : vector<8x128xf32> to vector<8x32xf32>
    %143 = vector.extract_strided_slice %140 {offsets = [0, 32], sizes = [8, 32], strides = [1, 1]} : vector<8x128xf32> to vector<8x32xf32>
    %144 = vector.extract_strided_slice %141 {offsets = [0, 64], sizes = [8, 32], strides = [1, 1]} : vector<8x128xf32> to vector<8x32xf32>
    %145 = vector.extract_strided_slice %140 {offsets = [0, 96], sizes = [8, 32], strides = [1, 1]} : vector<8x128xf32> to vector<8x32xf32>
    %146 = arith.mulf %143, %129 : vector<8x32xf32>
    %147 = arith.mulf %142, %144 : vector<8x32xf32>
    %148 = arith.addf %146, %147 : vector<8x32xf32>
    %149 = math.tanh %148 : vector<8x32xf32>
    %150 = arith.mulf %145, %149 : vector<8x32xf32>
    %c48 = arith.constant 48 : index
    %c0_39 = arith.constant 0 : index
    %151 = vector.load %arg10[%c48, %c0_39] : memref<64x32xf32, #tpu.memory_space<vmem>>, vector<8x32xf32>
    tpu.vector_store %arg10[%c48, %c0_39], %150 {strides = array<i32>} : memref<64x32xf32, #tpu.memory_space<vmem>>, vector<8x32xf32>,
    %152 = vector.extract_strided_slice %7 {offsets = [56, 0], sizes = [8, 128], strides = [1, 1]} : vector<64x128xf32> to vector<8x128xf32>
    %cst_40 = arith.constant dense<0.000000e+00> : vector<8x128xf32>
    %153 = tpu.matmul %150, %16, %cst_40 {dimension_numbers = #tpu.dot_dimension_numbers<[1], [0], [0], [1], [0, 0, 1, 1], [], []>} : vector<8x32xf32>, vector<32x128xf32>, vector<8x128xf32> -> vector<8x128xf32>
    %154 = arith.addf %152, %153 : vector<8x128xf32>
    %155 = arith.negf %154 : vector<8x128xf32>
    %156 = math.exp %155 : vector<8x128xf32>
    %cst_41 = arith.constant 1.000000e+00 : f32
    %157 = vector.broadcast %cst_41 : f32 to vector<8x128xf32>
    %158 = arith.addf %157, %156 : vector<8x128xf32>
    %159 = arith.divf %157, %158 : vector<8x128xf32>
    %160 = math.tanh %154 : vector<8x128xf32>
    %161 = vector.extract_strided_slice %159 {offsets = [0, 0], sizes = [8, 32], strides = [1, 1]} : vector<8x128xf32> to vector<8x32xf32>
    %162 = vector.extract_strided_slice %159 {offsets = [0, 32], sizes = [8, 32], strides = [1, 1]} : vector<8x128xf32> to vector<8x32xf32>
    %163 = vector.extract_strided_slice %160 {offsets = [0, 64], sizes = [8, 32], strides = [1, 1]} : vector<8x128xf32> to vector<8x32xf32>
    %164 = vector.extract_strided_slice %159 {offsets = [0, 96], sizes = [8, 32], strides = [1, 1]} : vector<8x128xf32> to vector<8x32xf32>
    %165 = arith.mulf %162, %148 : vector<8x32xf32>
    %166 = arith.mulf %161, %163 : vector<8x32xf32>
    %167 = arith.addf %165, %166 : vector<8x32xf32>
    %168 = math.tanh %167 : vector<8x32xf32>
    %169 = arith.mulf %164, %168 : vector<8x32xf32>
    %c56 = arith.constant 56 : index
    %c0_42 = arith.constant 0 : index
    %170 = vector.load %arg10[%c56, %c0_42] : memref<64x32xf32, #tpu.memory_space<vmem>>, vector<8x32xf32>
    tpu.vector_store %arg10[%c56, %c0_42], %169 {strides = array<i32>} : memref<64x32xf32, #tpu.memory_space<vmem>>, vector<8x32xf32>,
    %c1_43 = arith.constant 1 : index
    %c0_44 = arith.constant 0 : index
    %c0_45 = arith.constant 0 : index
    %171 = vector.load %arg2[%c1_43, %c0_44, %c0_45] : memref<2x32x128xf32, #tpu.memory_space<vmem>>, vector<1x32x128xf32>
    %172 = vector.shape_cast %171 : vector<1x32x128xf32> to vector<32x128xf32>
    %cst_46 = arith.constant 0.000000e+00 : f32
    %173 = vector.broadcast %cst_46 : f32 to vector<8x32xf32>
    %cst_47 = arith.constant 0.000000e+00 : f32
    %174 = vector.broadcast %cst_47 : f32 to vector<8x32xf32>
    %175 = vector.extract_strided_slice %14 {offsets = [56, 0], sizes = [8, 128], strides = [1, 1]} : vector<64x128xf32> to vector<8x128xf32>
    %cst_48 = arith.constant dense<0.000000e+00> : vector<8x128xf32>
    %176 = tpu.matmul %173, %172, %cst_48 {dimension_numbers = #tpu.dot_dimension_numbers<[1], [0], [0], [1], [0, 0, 1, 1], [], []>} : vector<8x32xf32>, vector<32x128xf32>, vector<8x128xf32> -> vector<8x128xf32>
    %177 = arith.addf %175, %176 : vector<8x128xf32>
    %178 = arith.negf %177 : vector<8x128xf32>
    %179 = math.exp %178 : vector<8x128xf32>
    %cst_49 = arith.constant 1.000000e+00 : f32
    %180 = vector.broadcast %cst_49 : f32 to vector<8x128xf32>
    %181 = arith.addf %180, %179 : vector<8x128xf32>
    %182 = arith.divf %180, %181 : vector<8x128xf32>
    %183 = math.tanh %177 : vector<8x128xf32>
    %184 = vector.extract_strided_slice %182 {offsets = [0, 0], sizes = [8, 32], strides = [1, 1]} : vector<8x128xf32> to vector<8x32xf32>
    %185 = vector.extract_strided_slice %182 {offsets = [0, 32], sizes = [8, 32], strides = [1, 1]} : vector<8x128xf32> to vector<8x32xf32>
    %186 = vector.extract_strided_slice %183 {offsets = [0, 64], sizes = [8, 32], strides = [1, 1]} : vector<8x128xf32> to vector<8x32xf32>
    %187 = vector.extract_strided_slice %182 {offsets = [0, 96], sizes = [8, 32], strides = [1, 1]} : vector<8x128xf32> to vector<8x32xf32>
    %188 = arith.mulf %185, %174 : vector<8x32xf32>
    %189 = arith.mulf %184, %186 : vector<8x32xf32>
    %190 = arith.addf %188, %189 : vector<8x32xf32>
    %191 = math.tanh %190 : vector<8x32xf32>
    %192 = arith.mulf %187, %191 : vector<8x32xf32>
    %c56_50 = arith.constant 56 : index
    %c0_51 = arith.constant 0 : index
    %193 = vector.load %arg11[%c56_50, %c0_51] : memref<64x32xf32, #tpu.memory_space<vmem>>, vector<8x32xf32>
    tpu.vector_store %arg11[%c56_50, %c0_51], %192 {strides = array<i32>} : memref<64x32xf32, #tpu.memory_space<vmem>>, vector<8x32xf32>,
    %194 = vector.extract_strided_slice %14 {offsets = [48, 0], sizes = [8, 128], strides = [1, 1]} : vector<64x128xf32> to vector<8x128xf32>
    %cst_52 = arith.constant dense<0.000000e+00> : vector<8x128xf32>
    %195 = tpu.matmul %192, %172, %cst_52 {dimension_numbers = #tpu.dot_dimension_numbers<[1], [0], [0], [1], [0, 0, 1, 1], [], []>} : vector<8x32xf32>, vector<32x128xf32>, vector<8x128xf32> -> vector<8x128xf32>
    %196 = arith.addf %194, %195 : vector<8x128xf32>
    %197 = arith.negf %196 : vector<8x128xf32>
    %198 = math.exp %197 : vector<8x128xf32>
    %cst_53 = arith.constant 1.000000e+00 : f32
    %199 = vector.broadcast %cst_53 : f32 to vector<8x128xf32>
    %200 = arith.addf %199, %198 : vector<8x128xf32>
    %201 = arith.divf %199, %200 : vector<8x128xf32>
    %202 = math.tanh %196 : vector<8x128xf32>
    %203 = vector.extract_strided_slice %201 {offsets = [0, 0], sizes = [8, 32], strides = [1, 1]} : vector<8x128xf32> to vector<8x32xf32>
    %204 = vector.extract_strided_slice %201 {offsets = [0, 32], sizes = [8, 32], strides = [1, 1]} : vector<8x128xf32> to vector<8x32xf32>
    %205 = vector.extract_strided_slice %202 {offsets = [0, 64], sizes = [8, 32], strides = [1, 1]} : vector<8x128xf32> to vector<8x32xf32>
    %206 = vector.extract_strided_slice %201 {offsets = [0, 96], sizes = [8, 32], strides = [1, 1]} : vector<8x128xf32> to vector<8x32xf32>
    %207 = arith.mulf %204, %190 : vector<8x32xf32>
    %208 = arith.mulf %203, %205 : vector<8x32xf32>
    %209 = arith.addf %207, %208 : vector<8x32xf32>
    %210 = math.tanh %209 : vector<8x32xf32>
    %211 = arith.mulf %206, %210 : vector<8x32xf32>
    %c48_54 = arith.constant 48 : index
    %c0_55 = arith.constant 0 : index
    %212 = vector.load %arg11[%c48_54, %c0_55] : memref<64x32xf32, #tpu.memory_space<vmem>>, vector<8x32xf32>
    tpu.vector_store %arg11[%c48_54, %c0_55], %211 {strides = array<i32>} : memref<64x32xf32, #tpu.memory_space<vmem>>, vector<8x32xf32>,
    %213 = vector.extract_strided_slice %14 {offsets = [40, 0], sizes = [8, 128], strides = [1, 1]} : vector<64x128xf32> to vector<8x128xf32>
    %cst_56 = arith.constant dense<0.000000e+00> : vector<8x128xf32>
    %214 = tpu.matmul %211, %172, %cst_56 {dimension_numbers = #tpu.dot_dimension_numbers<[1], [0], [0], [1], [0, 0, 1, 1], [], []>} : vector<8x32xf32>, vector<32x128xf32>, vector<8x128xf32> -> vector<8x128xf32>
    %215 = arith.addf %213, %214 : vector<8x128xf32>
    %216 = arith.negf %215 : vector<8x128xf32>
    %217 = math.exp %216 : vector<8x128xf32>
    %cst_57 = arith.constant 1.000000e+00 : f32
    %218 = vector.broadcast %cst_57 : f32 to vector<8x128xf32>
    %219 = arith.addf %218, %217 : vector<8x128xf32>
    %220 = arith.divf %218, %219 : vector<8x128xf32>
    %221 = math.tanh %215 : vector<8x128xf32>
    %222 = vector.extract_strided_slice %220 {offsets = [0, 0], sizes = [8, 32], strides = [1, 1]} : vector<8x128xf32> to vector<8x32xf32>
    %223 = vector.extract_strided_slice %220 {offsets = [0, 32], sizes = [8, 32], strides = [1, 1]} : vector<8x128xf32> to vector<8x32xf32>
    %224 = vector.extract_strided_slice %221 {offsets = [0, 64], sizes = [8, 32], strides = [1, 1]} : vector<8x128xf32> to vector<8x32xf32>
    %225 = vector.extract_strided_slice %220 {offsets = [0, 96], sizes = [8, 32], strides = [1, 1]} : vector<8x128xf32> to vector<8x32xf32>
    %226 = arith.mulf %223, %209 : vector<8x32xf32>
    %227 = arith.mulf %222, %224 : vector<8x32xf32>
    %228 = arith.addf %226, %227 : vector<8x32xf32>
    %229 = math.tanh %228 : vector<8x32xf32>
    %230 = arith.mulf %225, %229 : vector<8x32xf32>
    %c40_58 = arith.constant 40 : index
    %c0_59 = arith.constant 0 : index
    %231 = vector.load %arg11[%c40_58, %c0_59] : memref<64x32xf32, #tpu.memory_space<vmem>>, vector<8x32xf32>
    tpu.vector_store %arg11[%c40_58, %c0_59], %230 {strides = array<i32>} : memref<64x32xf32, #tpu.memory_space<vmem>>, vector<8x32xf32>,
    %232 = vector.extract_strided_slice %14 {offsets = [32, 0], sizes = [8, 128], strides = [1, 1]} : vector<64x128xf32> to vector<8x128xf32>
    %cst_60 = arith.constant dense<0.000000e+00> : vector<8x128xf32>
    %233 = tpu.matmul %230, %172, %cst_60 {dimension_numbers = #tpu.dot_dimension_numbers<[1], [0], [0], [1], [0, 0, 1, 1], [], []>} : vector<8x32xf32>, vector<32x128xf32>, vector<8x128xf32> -> vector<8x128xf32>
    %234 = arith.addf %232, %233 : vector<8x128xf32>
    %235 = arith.negf %234 : vector<8x128xf32>
    %236 = math.exp %235 : vector<8x128xf32>
    %cst_61 = arith.constant 1.000000e+00 : f32
    %237 = vector.broadcast %cst_61 : f32 to vector<8x128xf32>
    %238 = arith.addf %237, %236 : vector<8x128xf32>
    %239 = arith.divf %237, %238 : vector<8x128xf32>
    %240 = math.tanh %234 : vector<8x128xf32>
    %241 = vector.extract_strided_slice %239 {offsets = [0, 0], sizes = [8, 32], strides = [1, 1]} : vector<8x128xf32> to vector<8x32xf32>
    %242 = vector.extract_strided_slice %239 {offsets = [0, 32], sizes = [8, 32], strides = [1, 1]} : vector<8x128xf32> to vector<8x32xf32>
    %243 = vector.extract_strided_slice %240 {offsets = [0, 64], sizes = [8, 32], strides = [1, 1]} : vector<8x128xf32> to vector<8x32xf32>
    %244 = vector.extract_strided_slice %239 {offsets = [0, 96], sizes = [8, 32], strides = [1, 1]} : vector<8x128xf32> to vector<8x32xf32>
    %245 = arith.mulf %242, %228 : vector<8x32xf32>
    %246 = arith.mulf %241, %243 : vector<8x32xf32>
    %247 = arith.addf %245, %246 : vector<8x32xf32>
    %248 = math.tanh %247 : vector<8x32xf32>
    %249 = arith.mulf %244, %248 : vector<8x32xf32>
    %c32_62 = arith.constant 32 : index
    %c0_63 = arith.constant 0 : index
    %250 = vector.load %arg11[%c32_62, %c0_63] : memref<64x32xf32, #tpu.memory_space<vmem>>, vector<8x32xf32>
    tpu.vector_store %arg11[%c32_62, %c0_63], %249 {strides = array<i32>} : memref<64x32xf32, #tpu.memory_space<vmem>>, vector<8x32xf32>,
    %251 = vector.extract_strided_slice %14 {offsets = [24, 0], sizes = [8, 128], strides = [1, 1]} : vector<64x128xf32> to vector<8x128xf32>
    %cst_64 = arith.constant dense<0.000000e+00> : vector<8x128xf32>
    %252 = tpu.matmul %249, %172, %cst_64 {dimension_numbers = #tpu.dot_dimension_numbers<[1], [0], [0], [1], [0, 0, 1, 1], [], []>} : vector<8x32xf32>, vector<32x128xf32>, vector<8x128xf32> -> vector<8x128xf32>
    %253 = arith.addf %251, %252 : vector<8x128xf32>
    %254 = arith.negf %253 : vector<8x128xf32>
    %255 = math.exp %254 : vector<8x128xf32>
    %cst_65 = arith.constant 1.000000e+00 : f32
    %256 = vector.broadcast %cst_65 : f32 to vector<8x128xf32>
    %257 = arith.addf %256, %255 : vector<8x128xf32>
    %258 = arith.divf %256, %257 : vector<8x128xf32>
    %259 = math.tanh %253 : vector<8x128xf32>
    %260 = vector.extract_strided_slice %258 {offsets = [0, 0], sizes = [8, 32], strides = [1, 1]} : vector<8x128xf32> to vector<8x32xf32>
    %261 = vector.extract_strided_slice %258 {offsets = [0, 32], sizes = [8, 32], strides = [1, 1]} : vector<8x128xf32> to vector<8x32xf32>
    %262 = vector.extract_strided_slice %259 {offsets = [0, 64], sizes = [8, 32], strides = [1, 1]} : vector<8x128xf32> to vector<8x32xf32>
    %263 = vector.extract_strided_slice %258 {offsets = [0, 96], sizes = [8, 32], strides = [1, 1]} : vector<8x128xf32> to vector<8x32xf32>
    %264 = arith.mulf %261, %247 : vector<8x32xf32>
    %265 = arith.mulf %260, %262 : vector<8x32xf32>
    %266 = arith.addf %264, %265 : vector<8x32xf32>
    %267 = math.tanh %266 : vector<8x32xf32>
    %268 = arith.mulf %263, %267 : vector<8x32xf32>
    %c24_66 = arith.constant 24 : index
    %c0_67 = arith.constant 0 : index
    %269 = vector.load %arg11[%c24_66, %c0_67] : memref<64x32xf32, #tpu.memory_space<vmem>>, vector<8x32xf32>
    tpu.vector_store %arg11[%c24_66, %c0_67], %268 {strides = array<i32>} : memref<64x32xf32, #tpu.memory_space<vmem>>, vector<8x32xf32>,
    %270 = vector.extract_strided_slice %14 {offsets = [16, 0], sizes = [8, 128], strides = [1, 1]} : vector<64x128xf32> to vector<8x128xf32>
    %cst_68 = arith.constant dense<0.000000e+00> : vector<8x128xf32>
    %271 = tpu.matmul %268, %172, %cst_68 {dimension_numbers = #tpu.dot_dimension_numbers<[1], [0], [0], [1], [0, 0, 1, 1], [], []>} : vector<8x32xf32>, vector<32x128xf32>, vector<8x128xf32> -> vector<8x128xf32>
    %272 = arith.addf %270, %271 : vector<8x128xf32>
    %273 = arith.negf %272 : vector<8x128xf32>
    %274 = math.exp %273 : vector<8x128xf32>
    %cst_69 = arith.constant 1.000000e+00 : f32
    %275 = vector.broadcast %cst_69 : f32 to vector<8x128xf32>
    %276 = arith.addf %275, %274 : vector<8x128xf32>
    %277 = arith.divf %275, %276 : vector<8x128xf32>
    %278 = math.tanh %272 : vector<8x128xf32>
    %279 = vector.extract_strided_slice %277 {offsets = [0, 0], sizes = [8, 32], strides = [1, 1]} : vector<8x128xf32> to vector<8x32xf32>
    %280 = vector.extract_strided_slice %277 {offsets = [0, 32], sizes = [8, 32], strides = [1, 1]} : vector<8x128xf32> to vector<8x32xf32>
    %281 = vector.extract_strided_slice %278 {offsets = [0, 64], sizes = [8, 32], strides = [1, 1]} : vector<8x128xf32> to vector<8x32xf32>
    %282 = vector.extract_strided_slice %277 {offsets = [0, 96], sizes = [8, 32], strides = [1, 1]} : vector<8x128xf32> to vector<8x32xf32>
    %283 = arith.mulf %280, %266 : vector<8x32xf32>
    %284 = arith.mulf %279, %281 : vector<8x32xf32>
    %285 = arith.addf %283, %284 : vector<8x32xf32>
    %286 = math.tanh %285 : vector<8x32xf32>
    %287 = arith.mulf %282, %286 : vector<8x32xf32>
    %c16_70 = arith.constant 16 : index
    %c0_71 = arith.constant 0 : index
    %288 = vector.load %arg11[%c16_70, %c0_71] : memref<64x32xf32, #tpu.memory_space<vmem>>, vector<8x32xf32>
    tpu.vector_store %arg11[%c16_70, %c0_71], %287 {strides = array<i32>} : memref<64x32xf32, #tpu.memory_space<vmem>>, vector<8x32xf32>,
    %289 = vector.extract_strided_slice %14 {offsets = [8, 0], sizes = [8, 128], strides = [1, 1]} : vector<64x128xf32> to vector<8x128xf32>
    %cst_72 = arith.constant dense<0.000000e+00> : vector<8x128xf32>
    %290 = tpu.matmul %287, %172, %cst_72 {dimension_numbers = #tpu.dot_dimension_numbers<[1], [0], [0], [1], [0, 0, 1, 1], [], []>} : vector<8x32xf32>, vector<32x128xf32>, vector<8x128xf32> -> vector<8x128xf32>
    %291 = arith.addf %289, %290 : vector<8x128xf32>
    %292 = arith.negf %291 : vector<8x128xf32>
    %293 = math.exp %292 : vector<8x128xf32>
    %cst_73 = arith.constant 1.000000e+00 : f32
    %294 = vector.broadcast %cst_73 : f32 to vector<8x128xf32>
    %295 = arith.addf %294, %293 : vector<8x128xf32>
    %296 = arith.divf %294, %295 : vector<8x128xf32>
    %297 = math.tanh %291 : vector<8x128xf32>
    %298 = vector.extract_strided_slice %296 {offsets = [0, 0], sizes = [8, 32], strides = [1, 1]} : vector<8x128xf32> to vector<8x32xf32>
    %299 = vector.extract_strided_slice %296 {offsets = [0, 32], sizes = [8, 32], strides = [1, 1]} : vector<8x128xf32> to vector<8x32xf32>
    %300 = vector.extract_strided_slice %297 {offsets = [0, 64], sizes = [8, 32], strides = [1, 1]} : vector<8x128xf32> to vector<8x32xf32>
    %301 = vector.extract_strided_slice %296 {offsets = [0, 96], sizes = [8, 32], strides = [1, 1]} : vector<8x128xf32> to vector<8x32xf32>
    %302 = arith.mulf %299, %285 : vector<8x32xf32>
    %303 = arith.mulf %298, %300 : vector<8x32xf32>
    %304 = arith.addf %302, %303 : vector<8x32xf32>
    %305 = math.tanh %304 : vector<8x32xf32>
    %306 = arith.mulf %301, %305 : vector<8x32xf32>
    %c8_74 = arith.constant 8 : index
    %c0_75 = arith.constant 0 : index
    %307 = vector.load %arg11[%c8_74, %c0_75] : memref<64x32xf32, #tpu.memory_space<vmem>>, vector<8x32xf32>
    tpu.vector_store %arg11[%c8_74, %c0_75], %306 {strides = array<i32>} : memref<64x32xf32, #tpu.memory_space<vmem>>, vector<8x32xf32>,
    %308 = vector.extract_strided_slice %14 {offsets = [0, 0], sizes = [8, 128], strides = [1, 1]} : vector<64x128xf32> to vector<8x128xf32>
    %cst_76 = arith.constant dense<0.000000e+00> : vector<8x128xf32>
    %309 = tpu.matmul %306, %172, %cst_76 {dimension_numbers = #tpu.dot_dimension_numbers<[1], [0], [0], [1], [0, 0, 1, 1], [], []>} : vector<8x32xf32>, vector<32x128xf32>, vector<8x128xf32> -> vector<8x128xf32>
    %310 = arith.addf %308, %309 : vector<8x128xf32>
    %311 = arith.negf %310 : vector<8x128xf32>
    %312 = math.exp %311 : vector<8x128xf32>
    %cst_77 = arith.constant 1.000000e+00 : f32
    %313 = vector.broadcast %cst_77 : f32 to vector<8x128xf32>
    %314 = arith.addf %313, %312 : vector<8x128xf32>
    %315 = arith.divf %313, %314 : vector<8x128xf32>
    %316 = math.tanh %310 : vector<8x128xf32>
    %317 = vector.extract_strided_slice %315 {offsets = [0, 0], sizes = [8, 32], strides = [1, 1]} : vector<8x128xf32> to vector<8x32xf32>
    %318 = vector.extract_strided_slice %315 {offsets = [0, 32], sizes = [8, 32], strides = [1, 1]} : vector<8x128xf32> to vector<8x32xf32>
    %319 = vector.extract_strided_slice %316 {offsets = [0, 64], sizes = [8, 32], strides = [1, 1]} : vector<8x128xf32> to vector<8x32xf32>
    %320 = vector.extract_strided_slice %315 {offsets = [0, 96], sizes = [8, 32], strides = [1, 1]} : vector<8x128xf32> to vector<8x32xf32>
    %321 = arith.mulf %318, %304 : vector<8x32xf32>
    %322 = arith.mulf %317, %319 : vector<8x32xf32>
    %323 = arith.addf %321, %322 : vector<8x32xf32>
    %324 = math.tanh %323 : vector<8x32xf32>
    %325 = arith.mulf %320, %324 : vector<8x32xf32>
    %c0_78 = arith.constant 0 : index
    %c0_79 = arith.constant 0 : index
    %326 = vector.load %arg11[%c0_78, %c0_79] : memref<64x32xf32, #tpu.memory_space<vmem>>, vector<8x32xf32>
    tpu.vector_store %arg11[%c0_78, %c0_79], %325 {strides = array<i32>} : memref<64x32xf32, #tpu.memory_space<vmem>>, vector<8x32xf32>,
    %c0_80 = arith.constant 0 : index
    %c0_81 = arith.constant 0 : index
    %327 = vector.load %arg10[%c0_80, %c0_81] : memref<64x32xf32, #tpu.memory_space<vmem>>, vector<64x32xf32>
    %c0_82 = arith.constant 0 : index
    %c0_83 = arith.constant 0 : index
    %328 = vector.load %arg11[%c0_82, %c0_83] : memref<64x32xf32, #tpu.memory_space<vmem>>, vector<64x32xf32>
    %c0_84 = arith.constant 0 : index
    %c0_85 = arith.constant 0 : index
    %c0_86 = arith.constant 0 : index
    %329 = vector.load %arg4[%c0_84, %c0_85, %c0_86] : memref<2x64x128xf32, #tpu.memory_space<vmem>>, vector<1x64x128xf32>
    %330 = vector.shape_cast %329 : vector<1x64x128xf32> to vector<64x128xf32>
    %331 = vector.extract_strided_slice %330 {offsets = [0, 0], sizes = [32, 128], strides = [1, 1]} : vector<64x128xf32> to vector<32x128xf32>
    %cst_87 = arith.constant dense<0.000000e+00> : vector<64x128xf32>
    %332 = tpu.matmul %327, %331, %cst_87 {dimension_numbers = #tpu.dot_dimension_numbers<[1], [0], [0], [1], [0, 0, 1, 1], [], []>} : vector<64x32xf32>, vector<32x128xf32>, vector<64x128xf32> -> vector<64x128xf32>
    %333 = vector.extract_strided_slice %330 {offsets = [32, 0], sizes = [32, 128], strides = [1, 1]} : vector<64x128xf32> to vector<32x128xf32>
    %cst_88 = arith.constant dense<0.000000e+00> : vector<64x128xf32>
    %334 = tpu.matmul %328, %333, %cst_88 {dimension_numbers = #tpu.dot_dimension_numbers<[1], [0], [0], [1], [0, 0, 1, 1], [], []>} : vector<64x32xf32>, vector<32x128xf32>, vector<64x128xf32> -> vector<64x128xf32>
    %335 = arith.addf %332, %334 : vector<64x128xf32>
    %c0_89 = arith.constant 0 : index
    %c0_90 = arith.constant 0 : index
    %c0_91 = arith.constant 0 : index
    %336 = vector.load %arg6[%c0_89, %c0_90, %c0_91] : memref<2x1x128xf32, #tpu.memory_space<vmem>>, vector<1x1x128xf32>
    %337 = vector.shape_cast %336 : vector<1x1x128xf32> to vector<1x128xf32>
    %338 = vector.broadcast %337 : vector<1x128xf32> to vector<64x128xf32>
    %339 = arith.addf %335, %338 : vector<64x128xf32>
    %c0_92 = arith.constant 0 : index
    %c0_93 = arith.constant 0 : index
    %c0_94 = arith.constant 0 : index
    %340 = vector.load %arg5[%c0_92, %c0_93, %c0_94] : memref<2x32x128xf32, #tpu.memory_space<vmem>>, vector<1x32x128xf32>
    %341 = vector.shape_cast %340 : vector<1x32x128xf32> to vector<32x128xf32>
    %cst_95 = arith.constant 0.000000e+00 : f32
    %342 = vector.broadcast %cst_95 : f32 to vector<8x32xf32>
    %cst_96 = arith.constant 0.000000e+00 : f32
    %343 = vector.broadcast %cst_96 : f32 to vector<8x32xf32>
    %344 = vector.extract_strided_slice %339 {offsets = [0, 0], sizes = [8, 128], strides = [1, 1]} : vector<64x128xf32> to vector<8x128xf32>
    %cst_97 = arith.constant dense<0.000000e+00> : vector<8x128xf32>
    %345 = tpu.matmul %342, %341, %cst_97 {dimension_numbers = #tpu.dot_dimension_numbers<[1], [0], [0], [1], [0, 0, 1, 1], [], []>} : vector<8x32xf32>, vector<32x128xf32>, vector<8x128xf32> -> vector<8x128xf32>
    %346 = arith.addf %344, %345 : vector<8x128xf32>
    %347 = arith.negf %346 : vector<8x128xf32>
    %348 = math.exp %347 : vector<8x128xf32>
    %cst_98 = arith.constant 1.000000e+00 : f32
    %349 = vector.broadcast %cst_98 : f32 to vector<8x128xf32>
    %350 = arith.addf %349, %348 : vector<8x128xf32>
    %351 = arith.divf %349, %350 : vector<8x128xf32>
    %352 = math.tanh %346 : vector<8x128xf32>
    %353 = vector.extract_strided_slice %351 {offsets = [0, 0], sizes = [8, 32], strides = [1, 1]} : vector<8x128xf32> to vector<8x32xf32>
    %354 = vector.extract_strided_slice %351 {offsets = [0, 32], sizes = [8, 32], strides = [1, 1]} : vector<8x128xf32> to vector<8x32xf32>
    %355 = vector.extract_strided_slice %352 {offsets = [0, 64], sizes = [8, 32], strides = [1, 1]} : vector<8x128xf32> to vector<8x32xf32>
    %356 = vector.extract_strided_slice %351 {offsets = [0, 96], sizes = [8, 32], strides = [1, 1]} : vector<8x128xf32> to vector<8x32xf32>
    %357 = arith.mulf %354, %343 : vector<8x32xf32>
    %358 = arith.mulf %353, %355 : vector<8x32xf32>
    %359 = arith.addf %357, %358 : vector<8x32xf32>
    %360 = math.tanh %359 : vector<8x32xf32>
    %361 = arith.mulf %356, %360 : vector<8x32xf32>
    %362 = vector.extract_strided_slice %339 {offsets = [8, 0], sizes = [8, 128], strides = [1, 1]} : vector<64x128xf32> to vector<8x128xf32>
    %cst_99 = arith.constant dense<0.000000e+00> : vector<8x128xf32>
    %363 = tpu.matmul %361, %341, %cst_99 {dimension_numbers = #tpu.dot_dimension_numbers<[1], [0], [0], [1], [0, 0, 1, 1], [], []>} : vector<8x32xf32>, vector<32x128xf32>, vector<8x128xf32> -> vector<8x128xf32>
    %364 = arith.addf %362, %363 : vector<8x128xf32>
    %365 = arith.negf %364 : vector<8x128xf32>
    %366 = math.exp %365 : vector<8x128xf32>
    %cst_100 = arith.constant 1.000000e+00 : f32
    %367 = vector.broadcast %cst_100 : f32 to vector<8x128xf32>
    %368 = arith.addf %367, %366 : vector<8x128xf32>
    %369 = arith.divf %367, %368 : vector<8x128xf32>
    %370 = math.tanh %364 : vector<8x128xf32>
    %371 = vector.extract_strided_slice %369 {offsets = [0, 0], sizes = [8, 32], strides = [1, 1]} : vector<8x128xf32> to vector<8x32xf32>
    %372 = vector.extract_strided_slice %369 {offsets = [0, 32], sizes = [8, 32], strides = [1, 1]} : vector<8x128xf32> to vector<8x32xf32>
    %373 = vector.extract_strided_slice %370 {offsets = [0, 64], sizes = [8, 32], strides = [1, 1]} : vector<8x128xf32> to vector<8x32xf32>
    %374 = vector.extract_strided_slice %369 {offsets = [0, 96], sizes = [8, 32], strides = [1, 1]} : vector<8x128xf32> to vector<8x32xf32>
    %375 = arith.mulf %372, %359 : vector<8x32xf32>
    %376 = arith.mulf %371, %373 : vector<8x32xf32>
    %377 = arith.addf %375, %376 : vector<8x32xf32>
    %378 = math.tanh %377 : vector<8x32xf32>
    %379 = arith.mulf %374, %378 : vector<8x32xf32>
    %380 = vector.extract_strided_slice %339 {offsets = [16, 0], sizes = [8, 128], strides = [1, 1]} : vector<64x128xf32> to vector<8x128xf32>
    %cst_101 = arith.constant dense<0.000000e+00> : vector<8x128xf32>
    %381 = tpu.matmul %379, %341, %cst_101 {dimension_numbers = #tpu.dot_dimension_numbers<[1], [0], [0], [1], [0, 0, 1, 1], [], []>} : vector<8x32xf32>, vector<32x128xf32>, vector<8x128xf32> -> vector<8x128xf32>
    %382 = arith.addf %380, %381 : vector<8x128xf32>
    %383 = arith.negf %382 : vector<8x128xf32>
    %384 = math.exp %383 : vector<8x128xf32>
    %cst_102 = arith.constant 1.000000e+00 : f32
    %385 = vector.broadcast %cst_102 : f32 to vector<8x128xf32>
    %386 = arith.addf %385, %384 : vector<8x128xf32>
    %387 = arith.divf %385, %386 : vector<8x128xf32>
    %388 = math.tanh %382 : vector<8x128xf32>
    %389 = vector.extract_strided_slice %387 {offsets = [0, 0], sizes = [8, 32], strides = [1, 1]} : vector<8x128xf32> to vector<8x32xf32>
    %390 = vector.extract_strided_slice %387 {offsets = [0, 32], sizes = [8, 32], strides = [1, 1]} : vector<8x128xf32> to vector<8x32xf32>
    %391 = vector.extract_strided_slice %388 {offsets = [0, 64], sizes = [8, 32], strides = [1, 1]} : vector<8x128xf32> to vector<8x32xf32>
    %392 = vector.extract_strided_slice %387 {offsets = [0, 96], sizes = [8, 32], strides = [1, 1]} : vector<8x128xf32> to vector<8x32xf32>
    %393 = arith.mulf %390, %377 : vector<8x32xf32>
    %394 = arith.mulf %389, %391 : vector<8x32xf32>
    %395 = arith.addf %393, %394 : vector<8x32xf32>
    %396 = math.tanh %395 : vector<8x32xf32>
    %397 = arith.mulf %392, %396 : vector<8x32xf32>
    %398 = vector.extract_strided_slice %339 {offsets = [24, 0], sizes = [8, 128], strides = [1, 1]} : vector<64x128xf32> to vector<8x128xf32>
    %cst_103 = arith.constant dense<0.000000e+00> : vector<8x128xf32>
    %399 = tpu.matmul %397, %341, %cst_103 {dimension_numbers = #tpu.dot_dimension_numbers<[1], [0], [0], [1], [0, 0, 1, 1], [], []>} : vector<8x32xf32>, vector<32x128xf32>, vector<8x128xf32> -> vector<8x128xf32>
    %400 = arith.addf %398, %399 : vector<8x128xf32>
    %401 = arith.negf %400 : vector<8x128xf32>
    %402 = math.exp %401 : vector<8x128xf32>
    %cst_104 = arith.constant 1.000000e+00 : f32
    %403 = vector.broadcast %cst_104 : f32 to vector<8x128xf32>
    %404 = arith.addf %403, %402 : vector<8x128xf32>
    %405 = arith.divf %403, %404 : vector<8x128xf32>
    %406 = math.tanh %400 : vector<8x128xf32>
    %407 = vector.extract_strided_slice %405 {offsets = [0, 0], sizes = [8, 32], strides = [1, 1]} : vector<8x128xf32> to vector<8x32xf32>
    %408 = vector.extract_strided_slice %405 {offsets = [0, 32], sizes = [8, 32], strides = [1, 1]} : vector<8x128xf32> to vector<8x32xf32>
    %409 = vector.extract_strided_slice %406 {offsets = [0, 64], sizes = [8, 32], strides = [1, 1]} : vector<8x128xf32> to vector<8x32xf32>
    %410 = vector.extract_strided_slice %405 {offsets = [0, 96], sizes = [8, 32], strides = [1, 1]} : vector<8x128xf32> to vector<8x32xf32>
    %411 = arith.mulf %408, %395 : vector<8x32xf32>
    %412 = arith.mulf %407, %409 : vector<8x32xf32>
    %413 = arith.addf %411, %412 : vector<8x32xf32>
    %414 = math.tanh %413 : vector<8x32xf32>
    %415 = arith.mulf %410, %414 : vector<8x32xf32>
    %416 = vector.extract_strided_slice %339 {offsets = [32, 0], sizes = [8, 128], strides = [1, 1]} : vector<64x128xf32> to vector<8x128xf32>
    %cst_105 = arith.constant dense<0.000000e+00> : vector<8x128xf32>
    %417 = tpu.matmul %415, %341, %cst_105 {dimension_numbers = #tpu.dot_dimension_numbers<[1], [0], [0], [1], [0, 0, 1, 1], [], []>} : vector<8x32xf32>, vector<32x128xf32>, vector<8x128xf32> -> vector<8x128xf32>
    %418 = arith.addf %416, %417 : vector<8x128xf32>
    %419 = arith.negf %418 : vector<8x128xf32>
    %420 = math.exp %419 : vector<8x128xf32>
    %cst_106 = arith.constant 1.000000e+00 : f32
    %421 = vector.broadcast %cst_106 : f32 to vector<8x128xf32>
    %422 = arith.addf %421, %420 : vector<8x128xf32>
    %423 = arith.divf %421, %422 : vector<8x128xf32>
    %424 = math.tanh %418 : vector<8x128xf32>
    %425 = vector.extract_strided_slice %423 {offsets = [0, 0], sizes = [8, 32], strides = [1, 1]} : vector<8x128xf32> to vector<8x32xf32>
    %426 = vector.extract_strided_slice %423 {offsets = [0, 32], sizes = [8, 32], strides = [1, 1]} : vector<8x128xf32> to vector<8x32xf32>
    %427 = vector.extract_strided_slice %424 {offsets = [0, 64], sizes = [8, 32], strides = [1, 1]} : vector<8x128xf32> to vector<8x32xf32>
    %428 = vector.extract_strided_slice %423 {offsets = [0, 96], sizes = [8, 32], strides = [1, 1]} : vector<8x128xf32> to vector<8x32xf32>
    %429 = arith.mulf %426, %413 : vector<8x32xf32>
    %430 = arith.mulf %425, %427 : vector<8x32xf32>
    %431 = arith.addf %429, %430 : vector<8x32xf32>
    %432 = math.tanh %431 : vector<8x32xf32>
    %433 = arith.mulf %428, %432 : vector<8x32xf32>
    %434 = vector.extract_strided_slice %339 {offsets = [40, 0], sizes = [8, 128], strides = [1, 1]} : vector<64x128xf32> to vector<8x128xf32>
    %cst_107 = arith.constant dense<0.000000e+00> : vector<8x128xf32>
    %435 = tpu.matmul %433, %341, %cst_107 {dimension_numbers = #tpu.dot_dimension_numbers<[1], [0], [0], [1], [0, 0, 1, 1], [], []>} : vector<8x32xf32>, vector<32x128xf32>, vector<8x128xf32> -> vector<8x128xf32>
    %436 = arith.addf %434, %435 : vector<8x128xf32>
    %437 = arith.negf %436 : vector<8x128xf32>
    %438 = math.exp %437 : vector<8x128xf32>
    %cst_108 = arith.constant 1.000000e+00 : f32
    %439 = vector.broadcast %cst_108 : f32 to vector<8x128xf32>
    %440 = arith.addf %439, %438 : vector<8x128xf32>
    %441 = arith.divf %439, %440 : vector<8x128xf32>
    %442 = math.tanh %436 : vector<8x128xf32>
    %443 = vector.extract_strided_slice %441 {offsets = [0, 0], sizes = [8, 32], strides = [1, 1]} : vector<8x128xf32> to vector<8x32xf32>
    %444 = vector.extract_strided_slice %441 {offsets = [0, 32], sizes = [8, 32], strides = [1, 1]} : vector<8x128xf32> to vector<8x32xf32>
    %445 = vector.extract_strided_slice %442 {offsets = [0, 64], sizes = [8, 32], strides = [1, 1]} : vector<8x128xf32> to vector<8x32xf32>
    %446 = vector.extract_strided_slice %441 {offsets = [0, 96], sizes = [8, 32], strides = [1, 1]} : vector<8x128xf32> to vector<8x32xf32>
    %447 = arith.mulf %444, %431 : vector<8x32xf32>
    %448 = arith.mulf %443, %445 : vector<8x32xf32>
    %449 = arith.addf %447, %448 : vector<8x32xf32>
    %450 = math.tanh %449 : vector<8x32xf32>
    %451 = arith.mulf %446, %450 : vector<8x32xf32>
    %452 = vector.extract_strided_slice %339 {offsets = [48, 0], sizes = [8, 128], strides = [1, 1]} : vector<64x128xf32> to vector<8x128xf32>
    %cst_109 = arith.constant dense<0.000000e+00> : vector<8x128xf32>
    %453 = tpu.matmul %451, %341, %cst_109 {dimension_numbers = #tpu.dot_dimension_numbers<[1], [0], [0], [1], [0, 0, 1, 1], [], []>} : vector<8x32xf32>, vector<32x128xf32>, vector<8x128xf32> -> vector<8x128xf32>
    %454 = arith.addf %452, %453 : vector<8x128xf32>
    %455 = arith.negf %454 : vector<8x128xf32>
    %456 = math.exp %455 : vector<8x128xf32>
    %cst_110 = arith.constant 1.000000e+00 : f32
    %457 = vector.broadcast %cst_110 : f32 to vector<8x128xf32>
    %458 = arith.addf %457, %456 : vector<8x128xf32>
    %459 = arith.divf %457, %458 : vector<8x128xf32>
    %460 = math.tanh %454 : vector<8x128xf32>
    %461 = vector.extract_strided_slice %459 {offsets = [0, 0], sizes = [8, 32], strides = [1, 1]} : vector<8x128xf32> to vector<8x32xf32>
    %462 = vector.extract_strided_slice %459 {offsets = [0, 32], sizes = [8, 32], strides = [1, 1]} : vector<8x128xf32> to vector<8x32xf32>
    %463 = vector.extract_strided_slice %460 {offsets = [0, 64], sizes = [8, 32], strides = [1, 1]} : vector<8x128xf32> to vector<8x32xf32>
    %464 = vector.extract_strided_slice %459 {offsets = [0, 96], sizes = [8, 32], strides = [1, 1]} : vector<8x128xf32> to vector<8x32xf32>
    %465 = arith.mulf %462, %449 : vector<8x32xf32>
    %466 = arith.mulf %461, %463 : vector<8x32xf32>
    %467 = arith.addf %465, %466 : vector<8x32xf32>
    %468 = math.tanh %467 : vector<8x32xf32>
    %469 = arith.mulf %464, %468 : vector<8x32xf32>
    %470 = vector.extract_strided_slice %339 {offsets = [56, 0], sizes = [8, 128], strides = [1, 1]} : vector<64x128xf32> to vector<8x128xf32>
    %cst_111 = arith.constant dense<0.000000e+00> : vector<8x128xf32>
    %471 = tpu.matmul %469, %341, %cst_111 {dimension_numbers = #tpu.dot_dimension_numbers<[1], [0], [0], [1], [0, 0, 1, 1], [], []>} : vector<8x32xf32>, vector<32x128xf32>, vector<8x128xf32> -> vector<8x128xf32>
    %472 = arith.addf %470, %471 : vector<8x128xf32>
    %473 = arith.negf %472 : vector<8x128xf32>
    %474 = math.exp %473 : vector<8x128xf32>
    %cst_112 = arith.constant 1.000000e+00 : f32
    %475 = vector.broadcast %cst_112 : f32 to vector<8x128xf32>
    %476 = arith.addf %475, %474 : vector<8x128xf32>
    %477 = arith.divf %475, %476 : vector<8x128xf32>
    %478 = math.tanh %472 : vector<8x128xf32>
    %479 = vector.extract_strided_slice %477 {offsets = [0, 0], sizes = [8, 32], strides = [1, 1]} : vector<8x128xf32> to vector<8x32xf32>
    %480 = vector.extract_strided_slice %477 {offsets = [0, 32], sizes = [8, 32], strides = [1, 1]} : vector<8x128xf32> to vector<8x32xf32>
    %481 = vector.extract_strided_slice %478 {offsets = [0, 64], sizes = [8, 32], strides = [1, 1]} : vector<8x128xf32> to vector<8x32xf32>
    %482 = vector.extract_strided_slice %477 {offsets = [0, 96], sizes = [8, 32], strides = [1, 1]} : vector<8x128xf32> to vector<8x32xf32>
    %483 = arith.mulf %480, %467 : vector<8x32xf32>
    %484 = arith.mulf %479, %481 : vector<8x32xf32>
    %485 = arith.addf %483, %484 : vector<8x32xf32>
    %486 = math.tanh %485 : vector<8x32xf32>
    %487 = arith.mulf %482, %486 : vector<8x32xf32>
    %c1_113 = arith.constant 1 : index
    %c0_114 = arith.constant 0 : index
    %c0_115 = arith.constant 0 : index
    %488 = vector.load %arg4[%c1_113, %c0_114, %c0_115] : memref<2x64x128xf32, #tpu.memory_space<vmem>>, vector<1x64x128xf32>
    %489 = vector.shape_cast %488 : vector<1x64x128xf32> to vector<64x128xf32>
    %490 = vector.extract_strided_slice %327 {offsets = [56, 0], sizes = [8, 32], strides = [1, 1]} : vector<64x32xf32> to vector<8x32xf32>
    %491 = vector.extract_strided_slice %328 {offsets = [56, 0], sizes = [8, 32], strides = [1, 1]} : vector<64x32xf32> to vector<8x32xf32>
    %492 = vector.extract_strided_slice %489 {offsets = [0, 0], sizes = [32, 128], strides = [1, 1]} : vector<64x128xf32> to vector<32x128xf32>
    %cst_116 = arith.constant dense<0.000000e+00> : vector<8x128xf32>
    %493 = tpu.matmul %490, %492, %cst_116 {dimension_numbers = #tpu.dot_dimension_numbers<[1], [0], [0], [1], [0, 0, 1, 1], [], []>} : vector<8x32xf32>, vector<32x128xf32>, vector<8x128xf32> -> vector<8x128xf32>
    %494 = vector.extract_strided_slice %489 {offsets = [32, 0], sizes = [32, 128], strides = [1, 1]} : vector<64x128xf32> to vector<32x128xf32>
    %cst_117 = arith.constant dense<0.000000e+00> : vector<8x128xf32>
    %495 = tpu.matmul %491, %494, %cst_117 {dimension_numbers = #tpu.dot_dimension_numbers<[1], [0], [0], [1], [0, 0, 1, 1], [], []>} : vector<8x32xf32>, vector<32x128xf32>, vector<8x128xf32> -> vector<8x128xf32>
    %496 = arith.addf %493, %495 : vector<8x128xf32>
    %c1_118 = arith.constant 1 : index
    %c0_119 = arith.constant 0 : index
    %c0_120 = arith.constant 0 : index
    %497 = vector.load %arg6[%c1_118, %c0_119, %c0_120] : memref<2x1x128xf32, #tpu.memory_space<vmem>>, vector<1x1x128xf32>
    %498 = vector.shape_cast %497 : vector<1x1x128xf32> to vector<1x128xf32>
    %499 = vector.broadcast %498 : vector<1x128xf32> to vector<8x128xf32>
    %500 = arith.addf %496, %499 : vector<8x128xf32>
    %cst_121 = arith.constant 0.000000e+00 : f32
    %501 = vector.broadcast %cst_121 : f32 to vector<8x32xf32>
    %502 = arith.negf %500 : vector<8x128xf32>
    %503 = math.exp %502 : vector<8x128xf32>
    %cst_122 = arith.constant 1.000000e+00 : f32
    %504 = vector.broadcast %cst_122 : f32 to vector<8x128xf32>
    %505 = arith.addf %504, %503 : vector<8x128xf32>
    %506 = arith.divf %504, %505 : vector<8x128xf32>
    %507 = math.tanh %500 : vector<8x128xf32>
    %508 = vector.extract_strided_slice %506 {offsets = [0, 0], sizes = [8, 32], strides = [1, 1]} : vector<8x128xf32> to vector<8x32xf32>
    %509 = vector.extract_strided_slice %506 {offsets = [0, 32], sizes = [8, 32], strides = [1, 1]} : vector<8x128xf32> to vector<8x32xf32>
    %510 = vector.extract_strided_slice %507 {offsets = [0, 64], sizes = [8, 32], strides = [1, 1]} : vector<8x128xf32> to vector<8x32xf32>
    %511 = vector.extract_strided_slice %506 {offsets = [0, 96], sizes = [8, 32], strides = [1, 1]} : vector<8x128xf32> to vector<8x32xf32>
    %512 = arith.mulf %509, %501 : vector<8x32xf32>
    %513 = arith.mulf %508, %510 : vector<8x32xf32>
    %514 = arith.addf %512, %513 : vector<8x32xf32>
    %515 = math.tanh %514 : vector<8x32xf32>
    %516 = arith.mulf %511, %515 : vector<8x32xf32>
    %c0_123 = arith.constant 0 : index
    %c0_124 = arith.constant 0 : index
    %517 = vector.load %arg7[%c0_123, %c0_124] : memref<64x128xf32, #tpu.memory_space<vmem>>, vector<64x128xf32>
    %518 = vector.extract_strided_slice %517 {offsets = [0, 0], sizes = [32, 128], strides = [1, 1]} : vector<64x128xf32> to vector<32x128xf32>
    %cst_125 = arith.constant dense<0.000000e+00> : vector<8x128xf32>
    %519 = tpu.matmul %487, %518, %cst_125 {dimension_numbers = #tpu.dot_dimension_numbers<[1], [0], [0], [1], [0, 0, 1, 1], [], []>} : vector<8x32xf32>, vector<32x128xf32>, vector<8x128xf32> -> vector<8x128xf32>
    %520 = vector.extract_strided_slice %517 {offsets = [32, 0], sizes = [32, 128], strides = [1, 1]} : vector<64x128xf32> to vector<32x128xf32>
    %cst_126 = arith.constant dense<0.000000e+00> : vector<8x128xf32>
    %521 = tpu.matmul %516, %520, %cst_126 {dimension_numbers = #tpu.dot_dimension_numbers<[1], [0], [0], [1], [0, 0, 1, 1], [], []>} : vector<8x32xf32>, vector<32x128xf32>, vector<8x128xf32> -> vector<8x128xf32>
    %522 = arith.addf %519, %521 : vector<8x128xf32>
    %c0_127 = arith.constant 0 : index
    %c0_128 = arith.constant 0 : index
    %523 = vector.load %arg8[%c0_127, %c0_128] : memref<1x128xf32, #tpu.memory_space<vmem>>, vector<1x128xf32>
    %524 = vector.broadcast %523 : vector<1x128xf32> to vector<8x128xf32>
    %525 = arith.addf %522, %524 : vector<8x128xf32>
    %c0_129 = arith.constant 0 : index
    %c0_130 = arith.constant 0 : index
    %526 = vector.load %arg9[%c0_129, %c0_130] : memref<8x128xf32, #tpu.memory_space<vmem>>, vector<8x128xf32>
    tpu.vector_store %arg9[%c0_129, %c0_130], %525 {strides = array<i32>} : memref<8x128xf32, #tpu.memory_space<vmem>>, vector<8x128xf32>,
    return
  }
}

</mosaic_0001>

<bundles_post_ra>
// kernel: lstm_lyrics_melodies_forward.1
= control target key start
LH: loop header
LB: loop body
LE: loop exit
PB: predicated region body
PF: predicated region fallthrough
CT: control target
= control target key end

     0   :  { %vm51_vm0 = vcmask 261120   ;;  %v4482_v11 = vmov 0.0|0.0   ;;  %vm4483_vm1 = vmmov 0   ;;  %v4484_v21 = vmov 0.0   ;;  %s4485_s21 = smov 64   ;;  %s4486_s22 = smov 32   ;;  %s5190_s1 = inlined_call_operand.vmem [shape: f32[2,32,128], index: 1, kind: input, shape index: {}]   ;;  %s5191_s0 = inlined_call_operand.vmem [shape: f32[64,32], index: 0, kind: input, shape index: {}]   ;;  %s5192_s2 = inlined_call_operand.vmem [shape: f32[2,32,128], index: 2, kind: input, shape index: {}]   ;;  %s5193_s3 = inlined_call_operand.vmem [shape: f32[2,1,128], index: 3, kind: input, shape index: {}]   ;;  %s5194_s4 = inlined_call_operand.vmem [shape: f32[2,64,128], index: 4, kind: input, shape index: {}]   ;;  %s5195_s5 = inlined_call_operand.vmem [shape: f32[2,32,128], index: 5, kind: input, shape index: {}]   ;;  %s5196_s6 = inlined_call_operand.vmem [shape: f32[2,1,128], index: 6, kind: input, shape index: {}]   ;;  %s5197_s7 = inlined_call_operand.vmem [shape: f32[64,128], index: 7, kind: input, shape index: {}]   ;;  %s5198_s8 = inlined_call_operand.vmem [shape: f32[1,128], index: 8, kind: input, shape index: {}]   ;;  %s5199_s9 = inlined_call_operand.vmem [shape: f32[8,128], index: 9, kind: output, shape index: {}]  }
   0x1   :  { %v40_v0 = vld [vmem:[%s5190_s1] sm:$0xff]  ;;  %v41_v1 = vld [vmem:[%s5190_s1 + $0x8] sm:$0xff]  ;;  %v42_v2 = vld [vmem:[%s5190_s1 + $0x10] sm:$0xff] }
   0x2   :  { %v4069_v3 = vpack.c.bf16 %v41_v1, %v40_v0  ;;  %v43_v4 = vld [vmem:[%s5190_s1 + $0x18] sm:$0xff]  ;;  %v32_v5 = vld [vmem:[%s5191_s0] sm:$0xff]  ;;  %v300_v8 = vld [vmem:[%s5192_s2 + $0x8] sm:$0xff] }
   0x3   :  { %v4073_v6 = vpack.c.bf16 %v43_v4, %v42_v2  ;;  %3689 = vmatprep.mubr.msk.f32.mxu0 %vm51_vm0, %v32_v5  ;;  %3709 = vmatprep.mubr.msk.f32.mxu1 %vm51_vm0, %v32_v5  ;;  %v299_v7 = vld [vmem:[%s5192_s2] sm:$0xff]  ;;  %v4563_v9 = vld [vmem:[%s5191_s0 + $0x8] sm:$0xff]  ;;  %v4571_v12 = vld [vmem:[%s5191_s0 + $0x10] sm:$0xff] }
   0x4   :  { %4070 = vmatprep.subr.bf16.mxu0 %v4069_v3  ;;  %v4565_v10 = vpack.c.bf16 %v300_v8, %v299_v7  ;;  %v301_v13 = vld [vmem:[%s5192_s2 + $0x10] sm:$0xff]  ;;  %v302_v14 = vld [vmem:[%s5192_s2 + $0x18] sm:$0xff]  ;;  %v4594_v17 = vld [vmem:[%s5191_s0 + $0x20] sm:$0xff] }
   0x5   :  { %4072 = vmatpush3.bf16.msra.mxu0 %v4069_v3  ;;  %v4587_v15 = vld [vmem:[%s5191_s0 + $0x18] sm:$0xff]  ;;  %v4589_v16 = vpack.c.bf16 %v302_v14, %v301_v13  ;;  %v4604_v18 = vld [vmem:[%s5191_s0 + $0x28] sm:$0xff]  ;;  %v4610_v19 = vld [vmem:[%s5191_s0 + $0x30] sm:$0xff] }
   0x6   :  { %4074 = vmatprep.subr.bf16.mxu0 %v4073_v6  ;;  %v4620_v20 = vld [vmem:[%s5191_s0 + $0x38] sm:$0xff]  ;;  %v3388_v22 = vld [vmem:[%s5193_s3] ss:$0 sm:$0xff]  ;;  %v3398_v53 = vld [vmem:[%s5190_s1 + $0x28] sm:$0xff] }
   0x7   :  { %v3397_v52 = vld [vmem:[%s5190_s1 + $0x20] sm:$0xff]  ;;  %v3399_v54 = vld [vmem:[%s5190_s1 + $0x30] sm:$0xff]  ;;  %v3400_v56 = vld [vmem:[%s5190_s1 + $0x38] sm:$0xff] }
   0x8   :  { %v4077_v55 = vpack.c.bf16 %v3398_v53, %v3397_v52  ;;  %v4081_v57 = vpack.c.bf16 %v3400_v56, %v3399_v54  ;;  %v4693_v61 = vld [vmem:[%s5193_s3 + $0x1] ss:$0 sm:$0xff] }
   0x9   :  { %4076 = vmatpush3.bf16.msra.mxu0 %v4073_v6 }
   0xa   :  { %4085 = vmatprep.subr.bf16.mxu0 %v4482_v11  ;;  %4078 = vmatprep.subr.bf16.mxu1 %v4077_v55 }
   0xb   :  { %4080 = vmatpush3.bf16.msra.mxu1 %v4077_v55 }
   0xc   :  { %3690 = vmatmul.mubr.msk.f32.vlgmr.msra.gmra.mrb[0].mxu0 %vm51_vm0, %v4563_v9  ;;  %4082 = vmatprep.subr.bf16.mxu1 %v4081_v57 }
   0xd   :  { %4087 = vmatpush3.bf16.msra.mxu0 %v4565_v10  ;;  %3692 = vmatprep.mubr.msk.f32.mxu0 %vm51_vm0, %v4571_v12 }
   0xe   :  { %4088 = vmatprep.subr.bf16.mxu0 %v4482_v11 }
   0xf   :  { %4084 = vmatpush3.bf16.msra.mxu1 %v4081_v57 }
  0x10   :  { %3693 = vmatmul.mubr.msk.f32.gmra.mrb[2].mxu0 %vm51_vm0, %v4587_v15  ;;  %4091 = vmatprep.subr.bf16.mxu1 %v4482_v11 }
  0x11   :  { %3695 = vmatprep.mubr.msk.f32.mxu0 %vm51_vm0, %v4594_v17  ;;  %4090 = vmatpush3.bf16.msra.mxu0 %v4589_v16 }
  0x12   :  { %4097 = vmatprep.subr.bf16.mxu0 %v4482_v11  ;;  %3710 = vmatmul.mubr.msk.f32.vlgmr.msra.gmra.mrb[0].mxu1 %vm51_vm0, %v4563_v9 }
  0x13   :  { %4093 = vmatpush3.bf16.msra.mxu1 %v4565_v10  ;;  %3712 = vmatprep.mubr.msk.f32.mxu1 %vm51_vm0, %v4571_v12 }
  0x14   :  { %3696 = vmatmul.mubr.msk.f32.gmra.mrb[4].mxu0 %vm51_vm0, %v4604_v18  ;;  %4094 = vmatprep.subr.bf16.mxu1 %v4482_v11 }
  0x15   :  { %3698 = vmatprep.mubr.msk.f32.mxu0 %vm51_vm0, %v4610_v19 }
  0x16   :  { %3713 = vmatmul.mubr.msk.f32.gmra.mrb[2].mxu1 %vm51_vm0, %v4587_v15 }
  0x17   :  { %3715 = vmatprep.mubr.msk.f32.mxu1 %vm51_vm0, %v4594_v17  ;;  %4096 = vmatpush3.bf16.msra.mxu1 %v4589_v16 }
  0x18   :  { %3699 = vmatmul.mubr.msk.f32.gmra.mrb[6].mxu0 %vm51_vm0, %v4620_v20  ;;  %4103 = vmatprep.subr.bf16.mxu1 %v4482_v11 }
  0x19   :  { %3729 = vmatprep.mubr.msk.f32.mxu0 %vm4483_vm1, %v4484_v21 }
  0x1a   :  { %3716 = vmatmul.mubr.msk.f32.gmra.mrb[4].mxu1 %vm51_vm0, %v4604_v18 }
  0x1b   :  { %3718 = vmatprep.mubr.msk.f32.mxu1 %vm51_vm0, %v4610_v19 }
  0x1c   :  { %3730 = vmatmul.mubr.f32.vlgmr.msra.gmra.mrb[8].mxu0 %v4484_v21 }
  0x1d   :  { %4099 = vmatpush3.bf16.msra.mxu0 %v4565_v10  ;;  %3751 = vmatprep.mubr.msk.f32.mxu0 %vm4483_vm1, %v4484_v21 }
  0x1e   :  { %4100 = vmatprep.subr.bf16.mxu0 %v4482_v11  ;;  %3719 = vmatmul.mubr.msk.f32.gmra.mrb[6].mxu1 %vm51_vm0, %v4620_v20 }
  0x1f   :  { %3740 = vmatprep.mubr.msk.f32.mxu1 %vm4483_vm1, %v4484_v21 }
  0x21   :  { %4102 = vmatpush3.bf16.msra.mxu0 %v4589_v16 }
  0x22   :  { %4109 = vmatprep.subr.bf16.mxu0 %v4482_v11 }
  0xdf   :  { %v3691_v23 = vpop.f32.mrb[0].mxu0 }
  0xe0   :  { %v4636_v24 = vadd.f32 %v3691_v23, %v3388_v22  ;;  %v142_v25 = vpop.f32.mrb[1].mxu0 }
  0xe1   :  { %v143_v38 = vadd.f32 %v3388_v22, %v142_v25 }
  0xe3   :  { %v3694_v26 = vpop.f32.mrb[2].mxu0 }
  0xe4   :  { %v4638_v27 = vadd.f32 %v3694_v26, %v3388_v22  ;;  %v152_v28 = vpop.f32.mrb[3].mxu0 }
  0xe5   :  { %v4640_v29 = vadd.f32 %v3388_v22, %v152_v28  ;;  %v3711_v62 = vpop.f32.mrb[0].mxu1 }
  0xe6   :  { %v4696_v63 = vadd.f32 %v3711_v62, %v4693_v61  ;;  %v260_v0 = vpop.f32.mrb[1].mxu1 }
  0xe7   :  { %v3697_v30 = vpop.f32.mrb[4].mxu0  ;;  %v4699_v1 = vadd.f32 %v4693_v61, %v260_v0 }
  0xe8   :  { %v4642_v31 = vadd.f32 %v3697_v30, %v3388_v22  ;;  %v162_v32 = vpop.f32.mrb[5].mxu0 }
  0xe9   :  { %v4644_v33 = vadd.f32 %v3388_v22, %v162_v32  ;;  %v3714_v2 = vpop.f32.mrb[2].mxu1 }
  0xea   :  { %v4702_v3 = vadd.f32 %v3714_v2, %v4693_v61  ;;  %v270_v4 = vpop.f32.mrb[3].mxu1 }
  0xeb   :  { %v3700_v34 = vpop.f32.mrb[6].mxu0  ;;  %v4705_v5 = vadd.f32 %v4693_v61, %v270_v4 }
  0xec   :  { %v4646_v35 = vadd.f32 %v3700_v34, %v3388_v22  ;;  %v172_v36 = vpop.f32.mrb[7].mxu0 }
  0xed   :  { %v4648_v37 = vadd.f32 %v3388_v22, %v172_v36  ;;  %v3717_v6 = vpop.f32.mrb[4].mxu1 }
  0xee   :  { %v4708_v7 = vadd.f32 %v3717_v6, %v4693_v61  ;;  %v280_v8 = vpop.f32.mrb[5].mxu1 }
  0xef   :  { %v372_v39 = vpop.f32.mrb[8].mxu0  ;;  %v4711_v9 = vadd.f32 %v4693_v61, %v280_v8 }
  0xf0   :  { %v376_v40 = vadd.f32 %v372_v39, %v143_v38  ;;  %v3731_v41 = vpop.f32.mrb[9].mxu0 }
  0xf1   :  { %v4713_v12 = vpop.f32.mrb[6].mxu1 }
  0xf2   :  { %4282 = vtanh.f32 %v376_v40  ;;  %v3411_v43 = vmul.f32 -1.442695, %v376_v40  ;;  %v290_v13 = vpop.f32.mrb[7].mxu1 }
  0xf3   :  { %v4716_v14 = vadd.f32 %v4693_v61, %v290_v13 }
  0xf4   :  { %4284 = vpow2.f32 %v3411_v43 }
  0xfc   :  { %v4283_v42 = vpop.eup %4282 }
  0xfd   :  { %386 = vrot.lane.b32.xlu0 %v4283_v42, %s4485_s21 }
  0xfe   :  { %v4285_v44 = vpop.eup %4284 }
  0xff   :  { %v380_v45 = vadd.f32 1.0, %v4285_v44 }
 0x101   :  { %4286 = vrcp.f32 %v380_v45 }
 0x10b   :  { %v4287_v46 = vpop.eup %4286 }
 0x10c   :  { %v384_v49 = vmul.f32 0.0, %v4287_v46 }
 0x16f   :  { %v387_v47 = vpop.permute.xlu0 %386 }
 0x170   :  { %v389_v48 = vmul.f32 %v4287_v46, %v387_v47 }
 0x172   :  { %391 = vrot.lane.b32.xlu0 %v389_v48, %s4486_s22 }
 0x1e4   :  { %v392_v50 = vpop.permute.xlu0 %391 }
 0x1e5   :  { %v4652_v51 = vadd.f32 %v392_v50, %v384_v49 }
 0x1e7   :  { %4288 = vtanh.f32 %v4652_v51 }
 0x1f1   :  { %v4289_v58 = vpop.eup %4288 }
 0x1f2   :  { %397 = vrot.lane.b32.xlu1 %v4289_v58, %s4485_s21 }
 0x264   :  { %v398_v59 = vpop.permute.xlu1 %397 }
 0x265   :  { %v400_v60 = vmul.f32 %v4287_v46, %v398_v59 }
 0x267   :  { %402 = vrot.lane.b32.xlu1 %v400_v60, %s4486_s22 }
 0x2d9   :  { %v403_v15 = vpop.permute.xlu1 %402 }
 0x2da   :  { %405 = vst.msk [vmem:[#allocation2] sm:$0xff] %vm51_vm0, %v403_v15  ;;  %3741 = vmatmul.mubr.msk.f32.vlgmr.msra.gmra.mrb[8].mxu1 %vm51_vm0, %v403_v15 }
 0x2db   :  { %4105 = vmatpush3.bf16.msra.mxu1 %v4565_v10  ;;  %3762 = vmatprep.mubr.msk.f32.mxu1 %vm4483_vm1, %v4484_v21 }
 0x2dc   :  { %4106 = vmatprep.subr.bf16.mxu1 %v4482_v11 }
 0x2df   :  { %4108 = vmatpush3.bf16.msra.mxu1 %v4589_v16 }
 0x2e0   :  { %4115 = vmatprep.subr.bf16.mxu1 %v4482_v11 }
 0x3ad   :  { %v474_v17 = vpop.f32.mrb[8].mxu1 }
 0x3ae   :  { %v478_v18 = vadd.f32 %v474_v17, %v4636_v24  ;;  %v3742_v19 = vpop.f32.mrb[9].mxu1 }
 0x3b0   :  { %4290 = vtanh.f32 %v478_v18  ;;  %v3413_v22 = vmul.f32 -1.442695, %v478_v18 }
 0x3b2   :  { %4292 = vpow2.f32 %v3413_v22 }
 0x3ba   :  { %v4291_v20 = vpop.eup %4290 }
 0x3bb   :  { %488 = vrot.lane.b32.xlu0 %v4291_v20, %s4485_s21 }
 0x3bc   :  { %v4293_v23 = vpop.eup %4292 }
 0x3bd   :  { %v482_v25 = vadd.f32 1.0, %v4293_v23 }
 0x3bf   :  { %4294 = vrcp.f32 %v482_v25 }
 0x3c9   :  { %v4295_v26 = vpop.eup %4294 }
 0x3ca   :  { %v486_v32 = vmul.f32 %v4295_v26, %v4652_v51 }
 0x42d   :  { %v489_v28 = vpop.permute.xlu0 %488 }
 0x42e   :  { %v491_v30 = vmul.f32 %v4295_v26, %v489_v28 }
 0x430   :  { %493 = vrot.lane.b32.xlu1 %v491_v30, %s4486_s22 }
 0x4a2   :  { %v494_v34 = vpop.permute.xlu1 %493 }
 0x4a3   :  { %v496_v36 = vadd.f32 %v494_v34, %v486_v32 }
 0x4a5   :  { %4296 = vtanh.f32 %v496_v36 }
 0x4af   :  { %v4297_v24 = vpop.eup %4296 }
 0x4b0   :  { %499 = vrot.lane.b32.xlu0 %v4297_v24, %s4485_s21 }
 0x522   :  { %v500_v38 = vpop.permute.xlu0 %499 }
 0x523   :  { %v502_v39 = vmul.f32 %v4295_v26, %v500_v38 }
 0x525   :  { %504 = vrot.lane.b32.xlu1 %v502_v39, %s4486_s22 }
 0x597   :  { %v505_v40 = vpop.permute.xlu1 %504 }
 0x598   :  { %507 = vst.msk [vmem:[#allocation2 + $0x8] sm:$0xff] %vm51_vm0, %v505_v40  ;;  %3752 = vmatmul.mubr.msk.f32.vlgmr.msra.gmra.mrb[10].mxu0 %vm51_vm0, %v505_v40 }
 0x599   :  { %4111 = vmatpush3.bf16.msra.mxu0 %v4565_v10  ;;  %3773 = vmatprep.mubr.msk.f32.mxu0 %vm4483_vm1, %v4484_v21 }
 0x59a   :  { %4112 = vmatprep.subr.bf16.mxu0 %v4482_v11 }
 0x59d   :  { %4114 = vmatpush3.bf16.msra.mxu0 %v4589_v16 }
 0x59e   :  { %4121 = vmatprep.subr.bf16.mxu0 %v4482_v11 }
 0x66b   :  { %v576_v41 = vpop.f32.mrb[10].mxu0 }
 0x66c   :  { %v580_v42 = vadd.f32 %v576_v41, %v4640_v29  ;;  %v3753_v43 = vpop.f32.mrb[11].mxu0 }
 0x66e   :  { %4298 = vtanh.f32 %v580_v42  ;;  %v3415_v45 = vmul.f32 -1.442695, %v580_v42 }
 0x670   :  { %4300 = vpow2.f32 %v3415_v45 }
 0x678   :  { %v4299_v44 = vpop.eup %4298 }
 0x679   :  { %590 = vrot.lane.b32.xlu0 %v4299_v44, %s4485_s21 }
 0x67a   :  { %v4301_v46 = vpop.eup %4300 }
 0x67b   :  { %v584_v47 = vadd.f32 1.0, %v4301_v46 }
 0x67d   :  { %4302 = vrcp.f32 %v584_v47 }
 0x687   :  { %v4303_v48 = vpop.eup %4302 }
 0x688   :  { %v588_v51 = vmul.f32 %v4303_v48, %v496_v36 }
 0x6eb   :  { %v591_v49 = vpop.permute.xlu0 %590 }
 0x6ec   :  { %v593_v50 = vmul.f32 %v4303_v48, %v591_v49 }
 0x6ee   :  { %595 = vrot.lane.b32.xlu1 %v593_v50, %s4486_s22 }
 0x760   :  { %v596_v52 = vpop.permute.xlu1 %595 }
 0x761   :  { %v598_v53 = vadd.f32 %v596_v52, %v588_v51 }
 0x763   :  { %4304 = vtanh.f32 %v598_v53 }
 0x76d   :  { %v4305_v29 = vpop.eup %4304 }
 0x76e   :  { %601 = vrot.lane.b32.xlu0 %v4305_v29, %s4485_s21 }
 0x7e0   :  { %v602_v54 = vpop.permute.xlu0 %601 }
 0x7e1   :  { %v604_v55 = vmul.f32 %v4303_v48, %v602_v54 }
 0x7e3   :  { %606 = vrot.lane.b32.xlu1 %v604_v55, %s4486_s22 }
 0x855   :  { %v607_v56 = vpop.permute.xlu1 %606 }
 0x856   :  { %609 = vst.msk [vmem:[#allocation2 + $0x10] sm:$0xff] %vm51_vm0, %v607_v56  ;;  %3763 = vmatmul.mubr.msk.f32.vlgmr.msra.gmra.mrb[10].mxu1 %vm51_vm0, %v607_v56  ;;  %v3426_v56 = vld [vmem:[%s5192_s2 + $0x20] sm:$0xff] }
 0x857   :  { %4117 = vmatpush3.bf16.msra.mxu1 %v4565_v10  ;;  %3784 = vmatprep.mubr.msk.f32.mxu1 %vm4483_vm1, %v4484_v21 }
 0x858   :  { %4118 = vmatprep.subr.bf16.mxu1 %v4482_v11 }
 0x85b   :  { %4120 = vmatpush3.bf16.msra.mxu1 %v4589_v16 }
 0x85c   :  { %4127 = vmatprep.subr.bf16.mxu1 %v4482_v11 }
 0x929   :  { %v678_v57 = vpop.f32.mrb[10].mxu1 }
 0x92a   :  { %v682_v58 = vadd.f32 %v678_v57, %v4638_v27  ;;  %v3764_v59 = vpop.f32.mrb[11].mxu1  ;;  %v3427_v57 = vld [vmem:[%s5192_s2 + $0x28] sm:$0xff] }
 0x92b   :  { %v3428_v59 = vld [vmem:[%s5192_s2 + $0x30] sm:$0xff] }
 0x92c   :  { %4306 = vtanh.f32 %v682_v58  ;;  %v3417_v62 = vmul.f32 -1.442695, %v682_v58  ;;  %v4790_v58 = vpack.c.bf16 %v3427_v57, %v3426_v56 }
 0x92e   :  { %4308 = vpow2.f32 %v3417_v62 }
 0x936   :  { %v4307_v60 = vpop.eup %4306 }
 0x937   :  { %692 = vrot.lane.b32.xlu0 %v4307_v60, %s4485_s21  ;;  %v3429_v60 = vld [vmem:[%s5192_s2 + $0x38] sm:$0xff] }
 0x938   :  { %v4309_v0 = vpop.eup %4308 }
 0x939   :  { %v686_v2 = vadd.f32 1.0, %v4309_v0  ;;  %v4801_v0 = vpack.c.bf16 %v3429_v60, %v3428_v59 }
 0x93b   :  { %4310 = vrcp.f32 %v686_v2 }
 0x945   :  { %v4311_v4 = vpop.eup %4310 }
 0x946   :  { %v690_v13 = vmul.f32 %v4311_v4, %v598_v53 }
 0x9a9   :  { %v693_v6 = vpop.permute.xlu0 %692 }
 0x9aa   :  { %v695_v8 = vmul.f32 %v4311_v4, %v693_v6 }
 0x9ac   :  { %697 = vrot.lane.b32.xlu1 %v695_v8, %s4486_s22  ;;  %v296_v8 = vadd.f32 %v4713_v12, %v4693_v61 }
 0xa1e   :  { %v698_v15 = vpop.permute.xlu1 %697 }
 0xa1f   :  { %v700_v17 = vadd.f32 %v698_v15, %v690_v13 }
 0xa21   :  { %4312 = vtanh.f32 %v700_v17 }
 0xa2b   :  { %v4313_v27 = vpop.eup %4312 }
 0xa2c   :  { %703 = vrot.lane.b32.xlu0 %v4313_v27, %s4485_s21 }
 0xa9e   :  { %v704_v18 = vpop.permute.xlu0 %703 }
 0xa9f   :  { %v706_v19 = vmul.f32 %v4311_v4, %v704_v18 }
 0xaa1   :  { %708 = vrot.lane.b32.xlu1 %v706_v19, %s4486_s22 }
 0xb13   :  { %v709_v20 = vpop.permute.xlu1 %708 }
 0xb14   :  { %711 = vst.msk [vmem:[#allocation2 + $0x18] sm:$0xff] %vm51_vm0, %v709_v20  ;;  %3774 = vmatmul.mubr.msk.f32.vlgmr.msra.gmra.mrb[12].mxu0 %vm51_vm0, %v709_v20 }
 0xb15   :  { %4123 = vmatpush3.bf16.msra.mxu0 %v4565_v10  ;;  %3795 = vmatprep.mubr.msk.f32.mxu0 %vm4483_vm1, %v4484_v21 }
 0xb16   :  { %4124 = vmatprep.subr.bf16.mxu0 %v4482_v11 }
 0xb19   :  { %4126 = vmatpush3.bf16.msra.mxu0 %v4589_v16 }
 0xb1a   :  { %4133 = vmatprep.subr.bf16.mxu0 %v4482_v11 }
 0xbe7   :  { %v780_v22 = vpop.f32.mrb[12].mxu0 }
 0xbe8   :  { %v784_v23 = vadd.f32 %v780_v22, %v4644_v33  ;;  %v3775_v25 = vpop.f32.mrb[13].mxu0 }
 0xbea   :  { %4314 = vtanh.f32 %v784_v23  ;;  %v3419_v28 = vmul.f32 -1.442695, %v784_v23 }
 0xbec   :  { %4316 = vpow2.f32 %v3419_v28 }
 0xbf4   :  { %v4315_v26 = vpop.eup %4314 }
 0xbf5   :  { %794 = vrot.lane.b32.xlu0 %v4315_v26, %s4485_s21 }
 0xbf6   :  { %v4317_v30 = vpop.eup %4316 }
 0xbf7   :  { %v788_v32 = vadd.f32 1.0, %v4317_v30 }
 0xbf9   :  { %4318 = vrcp.f32 %v788_v32 }
 0xc03   :  { %v4319_v34 = vpop.eup %4318 }
 0xc04   :  { %v792_v38 = vmul.f32 %v4319_v34, %v700_v17 }
 0xc67   :  { %v795_v36 = vpop.permute.xlu0 %794 }
 0xc68   :  { %v797_v24 = vmul.f32 %v4319_v34, %v795_v36 }
 0xc6a   :  { %799 = vrot.lane.b32.xlu1 %v797_v24, %s4486_s22 }
 0xcdc   :  { %v800_v39 = vpop.permute.xlu1 %799 }
 0xcdd   :  { %v802_v40 = vadd.f32 %v800_v39, %v792_v38 }
 0xcdf   :  { %4320 = vtanh.f32 %v802_v40 }
 0xce9   :  { %v4321_v33 = vpop.eup %4320 }
 0xcea   :  { %805 = vrot.lane.b32.xlu0 %v4321_v33, %s4485_s21 }
 0xd5c   :  { %v806_v41 = vpop.permute.xlu0 %805 }
 0xd5d   :  { %v808_v42 = vmul.f32 %v4319_v34, %v806_v41 }
 0xd5f   :  { %810 = vrot.lane.b32.xlu1 %v808_v42, %s4486_s22 }
 0xdd1   :  { %v811_v43 = vpop.permute.xlu1 %810 }
 0xdd2   :  { %813 = vst.msk [vmem:[#allocation2 + $0x20] sm:$0xff] %vm51_vm0, %v811_v43  ;;  %3785 = vmatmul.mubr.msk.f32.vlgmr.msra.gmra.mrb[12].mxu1 %vm51_vm0, %v811_v43 }
 0xdd3   :  { %4129 = vmatpush3.bf16.msra.mxu1 %v4565_v10  ;;  %3806 = vmatprep.mubr.msk.f32.mxu1 %vm4483_vm1, %v4484_v21 }
 0xdd4   :  { %4130 = vmatprep.subr.bf16.mxu1 %v4482_v11 }
 0xdd7   :  { %4132 = vmatpush3.bf16.msra.mxu1 %v4589_v16 }
 0xdd8   :  { %4139 = vmatprep.subr.bf16.mxu1 %v4482_v11 }
 0xea5   :  { %v882_v44 = vpop.f32.mrb[12].mxu1 }
 0xea6   :  { %v886_v45 = vadd.f32 %v882_v44, %v4642_v31  ;;  %v3786_v46 = vpop.f32.mrb[13].mxu1 }
 0xea8   :  { %4322 = vtanh.f32 %v886_v45  ;;  %v3421_v48 = vmul.f32 -1.442695, %v886_v45 }
 0xeaa   :  { %4324 = vpow2.f32 %v3421_v48 }
 0xeb2   :  { %v4323_v47 = vpop.eup %4322 }
 0xeb3   :  { %896 = vrot.lane.b32.xlu0 %v4323_v47, %s4485_s21 }
 0xeb4   :  { %v4325_v10 = vpop.eup %4324 }
 0xeb5   :  { %v890_v49 = vadd.f32 1.0, %v4325_v10 }
 0xeb7   :  { %4326 = vrcp.f32 %v890_v49 }
 0xec1   :  { %v4327_v50 = vpop.eup %4326 }
 0xec2   :  { %v894_v16 = vmul.f32 %v4327_v50, %v802_v40 }
 0xf25   :  { %v897_v51 = vpop.permute.xlu0 %896 }
 0xf26   :  { %v899_v52 = vmul.f32 %v4327_v50, %v897_v51 }
 0xf28   :  { %901 = vrot.lane.b32.xlu1 %v899_v52, %s4486_s22 }
 0xf9a   :  { %v902_v53 = vpop.permute.xlu1 %901 }
 0xf9b   :  { %v904_v29 = vadd.f32 %v902_v53, %v894_v16 }
 0xf9d   :  { %4328 = vtanh.f32 %v904_v29 }
 0xfa7   :  { %v4329_v31 = vpop.eup %4328 }
 0xfa8   :  { %907 = vrot.lane.b32.xlu0 %v4329_v31, %s4485_s21 }
0x101a   :  { %v908_v54 = vpop.permute.xlu0 %907 }
0x101b   :  { %v910_v55 = vmul.f32 %v4327_v50, %v908_v54 }
0x101d   :  { %912 = vrot.lane.b32.xlu1 %v910_v55, %s4486_s22 }
0x108f   :  { %v913_v62 = vpop.permute.xlu1 %912 }
0x1090   :  { %915 = vst.msk [vmem:[#allocation2 + $0x28] sm:$0xff] %vm51_vm0, %v913_v62  ;;  %3796 = vmatmul.mubr.msk.f32.vlgmr.msra.gmra.mrb[14].mxu0 %vm51_vm0, %v913_v62 }
0x1091   :  { %4135 = vmatpush3.bf16.msra.mxu0 %v4790_v58  ;;  %3817 = vmatprep.mubr.msk.f32.mxu0 %vm4483_vm1, %v4484_v21 }
0x1092   :  { %4136 = vmatprep.subr.bf16.mxu0 %v4482_v11 }
0x1095   :  { %4138 = vmatpush3.bf16.msra.mxu0 %v4801_v0 }
0x1096   :  { %4145 = vmatprep.subr.bf16.mxu0 %v4482_v11 }
0x1098   :  { %3818 = vmatmul.mubr.f32.vlgmr.msra.gmra.mrb[16].mxu0 %v4484_v21 }
0x1099   :  { %4147 = vmatpush3.bf16.msra.mxu0 %v4790_v58  ;;  %3839 = vmatprep.mubr.msk.f32.mxu0 %vm4483_vm1, %v4484_v21 }
0x109a   :  { %4148 = vmatprep.subr.bf16.mxu0 %v4482_v11 }
0x109d   :  { %4150 = vmatpush3.bf16.msra.mxu0 %v4801_v0 }
0x109e   :  { %4157 = vmatprep.subr.bf16.mxu0 %v4482_v11 }
0x1163   :  { %v984_v2 = vpop.f32.mrb[14].mxu0 }
0x1164   :  { %v988_v4 = vadd.f32 %v984_v2, %v4648_v37  ;;  %v3797_v6 = vpop.f32.mrb[15].mxu0 }
0x1166   :  { %4330 = vtanh.f32 %v988_v4  ;;  %v3423_v19 = vmul.f32 -1.442695, %v988_v4 }
0x116b   :  { %v1191_v13 = vpop.f32.mrb[16].mxu0 }
0x116c   :  { %v1195_v15 = vadd.f32 %v1191_v13, %v296_v8  ;;  %v3819_v17 = vpop.f32.mrb[17].mxu0 }
0x116e   :  { %4332 = vtanh.f32 %v1195_v15  ;;  %v3430_v20 = vmul.f32 -1.442695, %v1195_v15 }
0x116f   :  { %4334 = vpow2.f32 %v3423_v19 }
0x1170   :  { %v4331_v27 = vpop.eup %4330  ;;  %4336 = vpow2.f32 %v3430_v20 }
0x1171   :  { %998 = vrot.lane.b32.xlu0 %v4331_v27, %s4485_s21 }
0x1178   :  { %v4333_v18 = vpop.eup %4332 }
0x1179   :  { %1205 = vrot.lane.b32.xlu1 %v4333_v18, %s4485_s21  ;;  %v4335_v37 = vpop.eup %4334 }
0x117a   :  { %v992_v22 = vadd.f32 1.0, %v4335_v37  ;;  %v4337_v23 = vpop.eup %4336 }
0x117b   :  { %v1199_v25 = vadd.f32 1.0, %v4337_v23 }
0x117c   :  { %4338 = vrcp.f32 %v992_v22 }
0x117d   :  { %4340 = vrcp.f32 %v1199_v25 }
0x1186   :  { %v4339_v61 = vpop.eup %4338 }
0x1187   :  { %v4341_v28 = vpop.eup %4340  ;;  %v996_v34 = vmul.f32 %v4339_v61, %v904_v29 }
0x1188   :  { %v1203_v38 = vmul.f32 0.0, %v4341_v28 }
0x11e3   :  { %v999_v12 = vpop.permute.xlu0 %998 }
0x11e4   :  { %v1001_v26 = vmul.f32 %v4339_v61, %v999_v12 }
0x11e6   :  { %1003 = vrot.lane.b32.xlu0 %v1001_v26, %s4486_s22 }
0x11eb   :  { %v1206_v30 = vpop.permute.xlu1 %1205 }
0x11ec   :  { %v1208_v32 = vmul.f32 %v4341_v28, %v1206_v30 }
0x11ee   :  { %1210 = vrot.lane.b32.xlu1 %v1208_v32, %s4486_s22 }
0x1258   :  { %v1004_v36 = vpop.permute.xlu0 %1003 }
0x1259   :  { %v4822_v24 = vadd.f32 %v1004_v36, %v996_v34 }
0x125b   :  { %4342 = vtanh.f32 %v4822_v24 }
0x1260   :  { %v1211_v39 = vpop.permute.xlu1 %1210 }
0x1261   :  { %v1213_v40 = vadd.f32 %v1211_v39, %v1203_v38 }
0x1263   :  { %4344 = vtanh.f32 %v1213_v40 }
0x1265   :  { %v4343_v33 = vpop.eup %4342 }
0x1266   :  { %1009 = vrot.lane.b32.xlu0 %v4343_v33, %s4485_s21 }
0x126d   :  { %v4345_v41 = vpop.eup %4344 }
0x126e   :  { %1216 = vrot.lane.b32.xlu1 %v4345_v41, %s4485_s21 }
0x12d8   :  { %v1010_v42 = vpop.permute.xlu0 %1009 }
0x12d9   :  { %v1012_v43 = vmul.f32 %v4339_v61, %v1010_v42 }
0x12db   :  { %1014 = vrot.lane.b32.xlu0 %v1012_v43, %s4486_s22 }
0x12e0   :  { %v1217_v44 = vpop.permute.xlu1 %1216 }
0x12e1   :  { %v1219_v45 = vmul.f32 %v4341_v28, %v1217_v44 }
0x12e3   :  { %1221 = vrot.lane.b32.xlu1 %v1219_v45, %s4486_s22 }
0x134d   :  { %v1015_v46 = vpop.permute.xlu0 %1014 }
0x134e   :  { %1017 = vst.msk [vmem:[#allocation2 + $0x30] sm:$0xff] %vm51_vm0, %v1015_v46  ;;  %3807 = vmatmul.mubr.msk.f32.vlgmr.msra.gmra.mrb[14].mxu1 %vm51_vm0, %v1015_v46 }
0x134f   :  { %4141 = vmatpush3.bf16.msra.mxu1 %v4790_v58  ;;  %3828 = vmatprep.mubr.msk.f32.mxu1 %vm4483_vm1, %v4484_v21 }
0x1350   :  { %4142 = vmatprep.subr.bf16.mxu1 %v4482_v11 }
0x1353   :  { %4144 = vmatpush3.bf16.msra.mxu1 %v4801_v0 }
0x1354   :  { %4151 = vmatprep.subr.bf16.mxu1 %v4482_v11 }
0x1355   :  { %v1222_v47 = vpop.permute.xlu1 %1221 }
0x1356   :  { %1224 = vst.msk [vmem:[#allocation3 + $0x38] sm:$0xff] %vm51_vm0, %v1222_v47  ;;  %3829 = vmatmul.mubr.msk.f32.vlgmr.msra.gmra.mrb[16].mxu1 %vm51_vm0, %v1222_v47 }
0x1357   :  { %4153 = vmatpush3.bf16.msra.mxu1 %v4790_v58  ;;  %3850 = vmatprep.mubr.msk.f32.mxu1 %vm4483_vm1, %v4484_v21 }
0x1358   :  { %4154 = vmatprep.subr.bf16.mxu1 %v4482_v11 }
0x135b   :  { %4156 = vmatpush3.bf16.msra.mxu1 %v4801_v0 }
0x135c   :  { %4163 = vmatprep.subr.bf16.mxu1 %v4482_v11 }
0x1421   :  { %v1086_v48 = vpop.f32.mrb[14].mxu1 }
0x1422   :  { %v4846_v10 = vadd.f32 %v1086_v48, %v4646_v35  ;;  %v3808_v49 = vpop.f32.mrb[15].mxu1 }
0x1429   :  { %v1293_v50 = vpop.f32.mrb[16].mxu1 }
0x142a   :  { %v1297_v51 = vadd.f32 %v1293_v50, %v4716_v14  ;;  %v3830_v52 = vpop.f32.mrb[17].mxu1 }
0x142c   :  { %4346 = vtanh.f32 %v1297_v51  ;;  %v3432_v53 = vmul.f32 -1.442695, %v1297_v51 }
0x142e   :  { %4348 = vpow2.f32 %v3432_v53 }
0x1436   :  { %v4347_v16 = vpop.eup %4346 }
0x1437   :  { %1307 = vrot.lane.b32.xlu0 %v4347_v16, %s4485_s21 }
0x1438   :  { %v4349_v29 = vpop.eup %4348 }
0x1439   :  { %v1301_v31 = vadd.f32 1.0, %v4349_v29 }
0x143b   :  { %4350 = vrcp.f32 %v1301_v31 }
0x1445   :  { %v4351_v54 = vpop.eup %4350 }
0x1446   :  { %v1305_v35 = vmul.f32 %v4351_v54, %v1213_v40 }
0x14a9   :  { %v1308_v55 = vpop.permute.xlu0 %1307 }
0x14aa   :  { %v1310_v56 = vmul.f32 %v4351_v54, %v1308_v55 }
0x14ac   :  { %1312 = vrot.lane.b32.xlu1 %v1310_v56, %s4486_s22 }
0x151e   :  { %v1313_v57 = vpop.permute.xlu1 %1312 }
0x151f   :  { %v1315_v59 = vadd.f32 %v1313_v57, %v1305_v35 }
0x1521   :  { %4352 = vtanh.f32 %v1315_v59 }
0x152b   :  { %v4353_v14 = vpop.eup %4352 }
0x152c   :  { %1318 = vrot.lane.b32.xlu0 %v4353_v14, %s4485_s21 }
0x159e   :  { %v1319_v60 = vpop.permute.xlu0 %1318 }
0x159f   :  { %v1321_v62 = vmul.f32 %v4351_v54, %v1319_v60 }
0x15a1   :  { %1323 = vrot.lane.b32.xlu1 %v1321_v62, %s4486_s22 }
0x1613   :  { %v1324_v2 = vpop.permute.xlu1 %1323 }
0x1614   :  { %1326 = vst.msk [vmem:[#allocation3 + $0x30] sm:$0xff] %vm51_vm0, %v1324_v2  ;;  %3840 = vmatmul.mubr.msk.f32.vlgmr.msra.gmra.mrb[18].mxu0 %vm51_vm0, %v1324_v2 }
0x1615   :  { %4159 = vmatpush3.bf16.msra.mxu0 %v4790_v58  ;;  %3861 = vmatprep.mubr.msk.f32.mxu0 %vm4483_vm1, %v4484_v21 }
0x1616   :  { %4160 = vmatprep.subr.bf16.mxu0 %v4482_v11 }
0x1619   :  { %4162 = vmatpush3.bf16.msra.mxu0 %v4801_v0 }
0x161a   :  { %4169 = vmatprep.subr.bf16.mxu0 %v4482_v11 }
0x16e7   :  { %v1395_v4 = vpop.f32.mrb[18].mxu0 }
0x16e8   :  { %v1399_v6 = vadd.f32 %v1395_v4, %v4708_v7  ;;  %v3841_v8 = vpop.f32.mrb[19].mxu0 }
0x16ea   :  { %4354 = vtanh.f32 %v1399_v6  ;;  %v3434_v15 = vmul.f32 -1.442695, %v1399_v6 }
0x16ec   :  { %4356 = vpow2.f32 %v3434_v15 }
0x16f4   :  { %v4355_v13 = vpop.eup %4354 }
0x16f5   :  { %1409 = vrot.lane.b32.xlu0 %v4355_v13, %s4485_s21 }
0x16f6   :  { %v4357_v17 = vpop.eup %4356 }
0x16f7   :  { %v1403_v27 = vadd.f32 1.0, %v4357_v17 }
0x16f9   :  { %4358 = vrcp.f32 %v1403_v27 }
0x1703   :  { %v4359_v18 = vpop.eup %4358 }
0x1704   :  { %v1407_v37 = vmul.f32 %v4359_v18, %v1315_v59 }
0x1767   :  { %v1410_v19 = vpop.permute.xlu0 %1409 }
0x1768   :  { %v1412_v20 = vmul.f32 %v4359_v18, %v1410_v19 }
0x176a   :  { %1414 = vrot.lane.b32.xlu1 %v1412_v20, %s4486_s22 }
0x17dc   :  { %v1415_v22 = vpop.permute.xlu1 %1414 }
0x17dd   :  { %v1417_v23 = vadd.f32 %v1415_v22, %v1407_v37 }
0x17df   :  { %4360 = vtanh.f32 %v1417_v23 }
0x17e9   :  { %v4361_v7 = vpop.eup %4360 }
0x17ea   :  { %1420 = vrot.lane.b32.xlu0 %v4361_v7, %s4485_s21 }
0x185c   :  { %v1421_v25 = vpop.permute.xlu0 %1420 }
0x185d   :  { %v1423_v61 = vmul.f32 %v4359_v18, %v1421_v25 }
0x185f   :  { %1425 = vrot.lane.b32.xlu1 %v1423_v61, %s4486_s22 }
0x18d1   :  { %v1426_v12 = vpop.permute.xlu1 %1425 }
0x18d2   :  { %1428 = vst.msk [vmem:[#allocation3 + $0x28] sm:$0xff] %vm51_vm0, %v1426_v12  ;;  %3851 = vmatmul.mubr.msk.f32.vlgmr.msra.gmra.mrb[18].mxu1 %vm51_vm0, %v1426_v12 }
0x18d3   :  { %4165 = vmatpush3.bf16.msra.mxu1 %v4790_v58  ;;  %3872 = vmatprep.mubr.msk.f32.mxu1 %vm4483_vm1, %v4484_v21 }
0x18d4   :  { %4166 = vmatprep.subr.bf16.mxu1 %v4482_v11 }
0x18d7   :  { %4168 = vmatpush3.bf16.msra.mxu1 %v4801_v0 }
0x18d8   :  { %4175 = vmatprep.subr.bf16.mxu1 %v4482_v11 }
0x19a5   :  { %v1497_v26 = vpop.f32.mrb[18].mxu1 }
0x19a6   :  { %v1501_v28 = vadd.f32 %v1497_v26, %v4711_v9  ;;  %v3852_v30 = vpop.f32.mrb[19].mxu1 }
0x19a8   :  { %4362 = vtanh.f32 %v1501_v28  ;;  %v3436_v34 = vmul.f32 -1.442695, %v1501_v28 }
0x19aa   :  { %4364 = vpow2.f32 %v3436_v34 }
0x19b2   :  { %v4363_v32 = vpop.eup %4362 }
0x19b3   :  { %1511 = vrot.lane.b32.xlu0 %v4363_v32, %s4485_s21 }
0x19b4   :  { %v4365_v36 = vpop.eup %4364 }
0x19b5   :  { %v1505_v38 = vadd.f32 1.0, %v4365_v36 }
0x19b7   :  { %4366 = vrcp.f32 %v1505_v38 }
0x19c1   :  { %v4367_v39 = vpop.eup %4366 }
0x19c2   :  { %v1509_v41 = vmul.f32 %v4367_v39, %v1417_v23 }
0x1a25   :  { %v1512_v40 = vpop.permute.xlu0 %1511 }
0x1a26   :  { %v1514_v33 = vmul.f32 %v4367_v39, %v1512_v40 }
0x1a28   :  { %1516 = vrot.lane.b32.xlu1 %v1514_v33, %s4486_s22 }
0x1a9a   :  { %v1517_v42 = vpop.permute.xlu1 %1516 }
0x1a9b   :  { %v1519_v43 = vadd.f32 %v1517_v42, %v1509_v41 }
0x1a9d   :  { %4368 = vtanh.f32 %v1519_v43 }
0x1aa7   :  { %v4369_v9 = vpop.eup %4368 }
0x1aa8   :  { %1522 = vrot.lane.b32.xlu0 %v4369_v9, %s4485_s21 }
0x1b1a   :  { %v1523_v44 = vpop.permute.xlu0 %1522 }
0x1b1b   :  { %v1525_v45 = vmul.f32 %v4367_v39, %v1523_v44 }
0x1b1d   :  { %1527 = vrot.lane.b32.xlu1 %v1525_v45, %s4486_s22 }
0x1b8f   :  { %v1528_v46 = vpop.permute.xlu1 %1527 }
0x1b90   :  { %1530 = vst.msk [vmem:[#allocation3 + $0x20] sm:$0xff] %vm51_vm0, %v1528_v46  ;;  %3862 = vmatmul.mubr.msk.f32.vlgmr.msra.gmra.mrb[20].mxu0 %vm51_vm0, %v1528_v46 }
0x1b91   :  { %4171 = vmatpush3.bf16.msra.mxu0 %v4790_v58  ;;  %3883 = vmatprep.mubr.msk.f32.mxu0 %vm4483_vm1, %v4484_v21 }
0x1b92   :  { %4172 = vmatprep.subr.bf16.mxu0 %v4482_v11 }
0x1b95   :  { %4174 = vmatpush3.bf16.msra.mxu0 %v4801_v0 }
0x1c63   :  { %v1599_v47 = vpop.f32.mrb[20].mxu0 }
0x1c64   :  { %v1603_v48 = vadd.f32 %v1599_v47, %v4702_v3  ;;  %v3863_v49 = vpop.f32.mrb[21].mxu0 }
0x1c66   :  { %4370 = vtanh.f32 %v1603_v48  ;;  %v3438_v51 = vmul.f32 -1.442695, %v1603_v48 }
0x1c68   :  { %4372 = vpow2.f32 %v3438_v51 }
0x1c70   :  { %v4371_v50 = vpop.eup %4370 }
0x1c71   :  { %1613 = vrot.lane.b32.xlu0 %v4371_v50, %s4485_s21 }
0x1c72   :  { %v4373_v52 = vpop.eup %4372 }
0x1c73   :  { %v1607_v16 = vadd.f32 1.0, %v4373_v52  ;;  %v1959_v52 = vld [vmem:[%s5194_s4 + $0x20] sm:$0xff] }
0x1c75   :  { %4374 = vrcp.f32 %v1607_v16  ;;  %v1960_v16 = vld [vmem:[%s5194_s4 + $0x28] sm:$0xff] }
0x1c7f   :  { %v4375_v53 = vpop.eup %4374 }
0x1c80   :  { %v1611_v54 = vmul.f32 %v4375_v53, %v1519_v43 }
0x1ce3   :  { %v1614_v29 = vpop.permute.xlu0 %1613 }
0x1ce4   :  { %v1616_v31 = vmul.f32 %v4375_v53, %v1614_v29  ;;  %v1961_v29 = vld [vmem:[%s5194_s4 + $0x30] sm:$0xff] }
0x1ce6   :  { %1618 = vrot.lane.b32.xlu1 %v1616_v31, %s4486_s22  ;;  %v1962_v31 = vld [vmem:[%s5194_s4 + $0x38] sm:$0xff] }
0x1d58   :  { %v1619_v55 = vpop.permute.xlu1 %1618 }
0x1d59   :  { %v1621_v56 = vadd.f32 %v1619_v55, %v1611_v54  ;;  %v4185_v54 = vpack.c.bf16 %v1962_v31, %v1961_v29  ;;  %v1955_v55 = vld [vmem:[%s5194_s4] sm:$0xff] }
0x1d5b   :  { %4376 = vtanh.f32 %v1621_v56 }
0x1d65   :  { %v4377_v3 = vpop.eup %4376 }
0x1d66   :  { %1624 = vrot.lane.b32.xlu0 %v4377_v3, %s4485_s21 }
0x1dd8   :  { %v1625_v35 = vpop.permute.xlu0 %1624 }
0x1dd9   :  { %v1627_v57 = vmul.f32 %v4375_v53, %v1625_v35  ;;  %v4181_v53 = vpack.c.bf16 %v1960_v16, %v1959_v52 }
0x1ddb   :  { %1629 = vrot.lane.b32.xlu1 %v1627_v57, %s4486_s22  ;;  %4182 = vmatprep.subr.bf16.mxu0 %v4181_v53 }
0x1e4d   :  { %v1630_v59 = vpop.permute.xlu1 %1629 }
0x1e4e   :  { %1632 = vst.msk [vmem:[#allocation3 + $0x18] sm:$0xff] %vm51_vm0, %v1630_v59  ;;  %3873 = vmatmul.mubr.msk.f32.vlgmr.msra.gmra.mrb[20].mxu1 %vm51_vm0, %v1630_v59  ;;  %v2236_v59 = vld [vmem:[%s5195_s5] sm:$0xff] }
0x1e4f   :  { %4177 = vmatpush3.bf16.msra.mxu1 %v4790_v58  ;;  %3894 = vmatprep.mubr.msk.f32.mxu1 %vm4483_vm1, %v4484_v21 }
0x1e50   :  { %4178 = vmatprep.subr.bf16.mxu1 %v4482_v11 }
0x1e53   :  { %4180 = vmatpush3.bf16.msra.mxu1 %v4801_v0 }
0x1e54   :  { %4197 = vmatprep.subr.bf16.mxu1 %v4482_v11 }
0x1f21   :  { %v1701_v14 = vpop.f32.mrb[20].mxu1 }
0x1f22   :  { %v1705_v60 = vadd.f32 %v1701_v14, %v4705_v5  ;;  %v3874_v62 = vpop.f32.mrb[21].mxu1  ;;  %v2237_v14 = vld [vmem:[%s5195_s5 + $0x8] sm:$0xff] }
0x1f23   :  { %v2238_v62 = vld [vmem:[%s5195_s5 + $0x10] sm:$0xff] }
0x1f24   :  { %4378 = vtanh.f32 %v1705_v60  ;;  %v3440_v4 = vmul.f32 -1.442695, %v1705_v60  ;;  %v4944_v60 = vpack.c.bf16 %v2237_v14, %v2236_v59 }
0x1f26   :  { %4380 = vpow2.f32 %v3440_v4 }
0x1f2e   :  { %v4379_v2 = vpop.eup %4378 }
0x1f2f   :  { %1715 = vrot.lane.b32.xlu0 %v4379_v2, %s4485_s21  ;;  %v2239_v2 = vld [vmem:[%s5195_s5 + $0x18] sm:$0xff] }
0x1f30   :  { %v4381_v58 = vpop.eup %4380  ;;  %v4954_v4 = vpack.c.bf16 %v2239_v2, %v2238_v62 }
0x1f31   :  { %v1709_v6 = vadd.f32 1.0, %v4381_v58 }
0x1f33   :  { %4382 = vrcp.f32 %v1709_v6  ;;  %v1957_v6 = vld [vmem:[%s5194_s4 + $0x10] sm:$0xff] }
0x1f3d   :  { %v4383_v8 = vpop.eup %4382 }
0x1f3e   :  { %v1713_v0 = vmul.f32 %v4383_v8, %v1621_v56  ;;  %v1956_v56 = vld [vmem:[%s5194_s4 + $0x8] sm:$0xff] }
0x1f3f   :  { %v4189_v35 = vpack.c.bf16 %v1956_v56, %v1955_v55 }
0x1fa1   :  { %v1716_v13 = vpop.permute.xlu0 %1715 }
0x1fa2   :  { %v1718_v15 = vmul.f32 %v4383_v8, %v1716_v13 }
0x1fa4   :  { %1720 = vrot.lane.b32.xlu1 %v1718_v15, %s4486_s22 }
0x2016   :  { %v1721_v17 = vpop.permute.xlu1 %1720 }
0x2017   :  { %v1723_v27 = vadd.f32 %v1721_v17, %v1713_v0 }
0x2019   :  { %4384 = vtanh.f32 %v1723_v27 }
0x2023   :  { %v4385_v5 = vpop.eup %4384 }
0x2024   :  { %1726 = vrot.lane.b32.xlu0 %v4385_v5, %s4485_s21  ;;  %v1951_v5 = vld [vmem:[#allocation3 + $0x20] sm:$0xff] }
0x2096   :  { %v1727_v18 = vpop.permute.xlu0 %1726 }
0x2097   :  { %v1729_v19 = vmul.f32 %v4383_v8, %v1727_v18  ;;  %v1958_v8 = vld [vmem:[%s5194_s4 + $0x18] sm:$0xff]  ;;  %v1952_v18 = vld [vmem:[#allocation3 + $0x28] sm:$0xff] }
0x2098   :  { %v4193_v15 = vpack.c.bf16 %v1958_v8, %v1957_v6 }
0x2099   :  { %1731 = vrot.lane.b32.xlu1 %v1729_v19, %s4486_s22  ;;  %v1953_v19 = vld [vmem:[#allocation3 + $0x30] sm:$0xff] }
0x210b   :  { %v1732_v20 = vpop.permute.xlu1 %1731 }
0x210c   :  { %1734 = vst.msk [vmem:[#allocation3 + $0x10] sm:$0xff] %vm51_vm0, %v1732_v20  ;;  %3884 = vmatmul.mubr.msk.f32.vlgmr.msra.gmra.mrb[22].mxu0 %vm51_vm0, %v1732_v20  ;;  %v4980_v20 = vld [vmem:[#allocation3 + $0x38] sm:$0xff] }
0x210d   :  { %4184 = vmatpush3.bf16.msra.mxu0 %v4181_v53 }
0x210e   :  { %4186 = vmatprep.subr.bf16.mxu0 %v4185_v54 }
0x2111   :  { %4188 = vmatpush3.bf16.msra.mxu0 %v4185_v54 }
0x2112   :  { %4190 = vmatprep.subr.bf16.mxu0 %v4189_v35 }
0x2113   :  { %v1949_v17 = vld [vmem:[#allocation3 + $0x10] sm:$0xff] }
0x21df   :  { %v1803_v37 = vpop.f32.mrb[22].mxu0 }
0x21e0   :  { %v1807_v22 = vadd.f32 %v1803_v37, %v4696_v63  ;;  %v3885_v23 = vpop.f32.mrb[23].mxu0  ;;  %v1939_v37 = vld [vmem:[#allocation2] sm:$0xff] }
0x21e1   :  { %v1941_v23 = vld [vmem:[#allocation2 + $0x10] sm:$0xff] }
0x21e2   :  { %4386 = vtanh.f32 %v1807_v22  ;;  %v3442_v25 = vmul.f32 -1.442695, %v1807_v22  ;;  %v1940_v22 = vld [vmem:[#allocation2 + $0x8] sm:$0xff] }
0x21e4   :  { %4388 = vpow2.f32 %v3442_v25  ;;  %v1943_v25 = vld [vmem:[#allocation2 + $0x20] sm:$0xff] }
0x21ec   :  { %v4387_v7 = vpop.eup %4386 }
0x21ed   :  { %1817 = vrot.lane.b32.xlu0 %v4387_v7, %s4485_s21  ;;  %v1942_v7 = vld [vmem:[#allocation2 + $0x18] sm:$0xff] }
0x21ee   :  { %v4389_v61 = vpop.eup %4388 }
0x21ef   :  { %v1811_v12 = vadd.f32 1.0, %v4389_v61  ;;  %v1944_v61 = vld [vmem:[#allocation2 + $0x28] sm:$0xff] }
0x21f1   :  { %4390 = vrcp.f32 %v1811_v12  ;;  %v1945_v12 = vld [vmem:[#allocation2 + $0x30] sm:$0xff] }
0x21fb   :  { %v4391_v26 = vpop.eup %4390 }
0x21fc   :  { %v1815_v32 = vmul.f32 %v4391_v26, %v1723_v27  ;;  %v1950_v27 = vld [vmem:[#allocation3 + $0x18] sm:$0xff] }
0x225f   :  { %v1818_v28 = vpop.permute.xlu0 %1817 }
0x2260   :  { %v1820_v30 = vmul.f32 %v4391_v26, %v1818_v28 }
0x2262   :  { %1822 = vrot.lane.b32.xlu1 %v1820_v30, %s4486_s22  ;;  %v4998_v30 = vld [vmem:[%s5196_s6] ss:$0 sm:$0xff] }
0x22d4   :  { %v1823_v34 = vpop.permute.xlu1 %1822 }
0x22d5   :  { %v1825_v36 = vadd.f32 %v1823_v34, %v1815_v32 }
0x22d7   :  { %4392 = vtanh.f32 %v1825_v36 }
0x22e1   :  { %v4393_v63 = vpop.eup %4392 }
0x22e2   :  { %1828 = vrot.lane.b32.xlu0 %v4393_v63, %s4485_s21 }
0x2354   :  { %v1829_v38 = vpop.permute.xlu0 %1828 }
0x2355   :  { %v1831_v39 = vmul.f32 %v4391_v26, %v1829_v38 }
0x2357   :  { %1833 = vrot.lane.b32.xlu1 %v1831_v39, %s4486_s22 }
0x23c9   :  { %v1834_v40 = vpop.permute.xlu1 %1833 }
0x23ca   :  { %1836 = vst.msk [vmem:[#allocation3 + $0x8] sm:$0xff] %vm51_vm0, %v1834_v40  ;;  %3895 = vmatmul.mubr.msk.f32.vlgmr.msra.gmra.mrb[22].mxu1 %vm51_vm0, %v1834_v40 }
0x23cb   :  { %3945 = vmatprep.mubr.msk.f32.mxu1 %vm4483_vm1, %v4484_v21  ;;  %4199 = vmatpush3.bf16.msra.mxu1 %v4944_v60 }
0x23cc   :  { %4200 = vmatprep.subr.bf16.mxu1 %v4482_v11 }
0x23cf   :  { %4202 = vmatpush3.bf16.msra.mxu1 %v4954_v4 }
0x23d0   :  { %4203 = vmatprep.subr.bf16.mxu1 %v4482_v11 }
0x23d1   :  { %v1948_v0 = vld [vmem:[#allocation3 + $0x8] sm:$0xff] }
0x23d2   :  { %3946 = vmatmul.mubr.f32.vlgmr.msra.gmra.mrb[24].mxu1 %v4484_v21 }
0x23d3   :  { %4205 = vmatpush3.bf16.msra.mxu1 %v4944_v60  ;;  %3956 = vmatprep.mubr.msk.f32.mxu1 %vm4483_vm1, %v4484_v21 }
0x23d4   :  { %4206 = vmatprep.subr.bf16.mxu1 %v4482_v11 }
0x23d7   :  { %4208 = vmatpush3.bf16.msra.mxu1 %v4954_v4 }
0x23d8   :  { %4209 = vmatprep.subr.bf16.mxu1 %v4482_v11 }
0x249d   :  { %v1905_v33 = vpop.f32.mrb[22].mxu1 }
0x249e   :  { %v1909_v41 = vadd.f32 %v1905_v33, %v4699_v1  ;;  %v3896_v42 = vpop.f32.mrb[23].mxu1 }
0x24a0   :  { %4394 = vtanh.f32 %v1909_v41  ;;  %v3444_v9 = vmul.f32 -1.442695, %v1909_v41 }
0x24a2   :  { %4396 = vpow2.f32 %v3444_v9 }
0x24a5   :  { %v2306_v26 = vpop.f32.mrb[24].mxu1 }
0x24a6   :  { %v3947_v28 = vpop.f32.mrb[25].mxu1 }
0x24aa   :  { %v4395_v43 = vpop.eup %4394 }
0x24ab   :  { %1919 = vrot.lane.b32.xlu0 %v4395_v43, %s4485_s21 }
0x24ac   :  { %v4397_v44 = vpop.eup %4396 }
0x24ad   :  { %v1913_v45 = vadd.f32 1.0, %v4397_v44 }
0x24af   :  { %4398 = vrcp.f32 %v1913_v45 }
0x24b9   :  { %v4399_v46 = vpop.eup %4398 }
0x24ba   :  { %v1917_v49 = vmul.f32 %v4399_v46, %v1825_v36 }
0x251d   :  { %v1920_v47 = vpop.permute.xlu0 %1919 }
0x251e   :  { %v1922_v48 = vmul.f32 %v4399_v46, %v1920_v47 }
0x2520   :  { %1924 = vrot.lane.b32.xlu1 %v1922_v48, %s4486_s22 }
0x2592   :  { %v1925_v50 = vpop.permute.xlu1 %1924 }
0x2593   :  { %v1927_v51 = vadd.f32 %v1925_v50, %v1917_v49 }
0x2595   :  { %4400 = vtanh.f32 %v1927_v51 }
0x259f   :  { %v4401_v1 = vpop.eup %4400 }
0x25a0   :  { %1930 = vrot.lane.b32.xlu0 %v4401_v1, %s4485_s21 }
0x2612   :  { %v1931_v3 = vpop.permute.xlu0 %1930 }
0x2613   :  { %v1933_v57 = vmul.f32 %v4399_v46, %v1931_v3 }
0x2615   :  { %1935 = vrot.lane.b32.xlu1 %v1933_v57, %s4486_s22 }
0x2687   :  { %v1936_v58 = vpop.permute.xlu1 %1935 }
0x2688   :  { %1938 = vst.msk [vmem:[#allocation3] sm:$0xff] %vm51_vm0, %v1936_v58 }
0x268f   :  { %v1947_v13 = vld [vmem:[#allocation3] sm:$0xff] }
0x2690   :  { %3905 = vmatprep.mubr.msk.f32.mxu0 %vm51_vm0, %v1947_v13 }
0x2691   :  { %3906 = vmatmul.mubr.msk.f32.vlgmr.msra.gmra.mrb[24].mxu0 %vm51_vm0, %v1948_v0 }
0x2692   :  { %3908 = vmatprep.mubr.msk.f32.mxu0 %vm51_vm0, %v1949_v17  ;;  %4192 = vmatpush3.bf16.msra.mxu0 %v4189_v35 }
0x2693   :  { %4194 = vmatprep.subr.bf16.mxu0 %v4193_v15 }
0x2695   :  { %3909 = vmatmul.mubr.msk.f32.gmra.mrb[26].mxu0 %vm51_vm0, %v1950_v27 }
0x2696   :  { %3911 = vmatprep.mubr.msk.f32.mxu0 %vm51_vm0, %v1951_v5  ;;  %4196 = vmatpush3.bf16.msra.mxu0 %v4193_v15 }
0x2697   :  { %4221 = vmatprep.subr.bf16.mxu0 %v4482_v11 }
0x2699   :  { %3912 = vmatmul.mubr.msk.f32.gmra.mrb[28].mxu0 %vm51_vm0, %v1952_v18 }
0x269a   :  { %3914 = vmatprep.mubr.msk.f32.mxu0 %vm51_vm0, %v1953_v19 }
0x269d   :  { %3915 = vmatmul.mubr.msk.f32.gmra.mrb[30].mxu0 %vm51_vm0, %v4980_v20 }
0x269e   :  { %3925 = vmatprep.mubr.msk.f32.mxu0 %vm51_vm0, %v1939_v37 }
0x26a1   :  { %3926 = vmatmul.mubr.msk.f32.vlgmr.msra.gmra.mrb[24].mxu0 %vm51_vm0, %v1940_v22 }
0x26a2   :  { %3928 = vmatprep.mubr.msk.f32.mxu0 %vm51_vm0, %v1941_v23  ;;  %4223 = vmatpush3.bf16.msra.mxu0 %v4944_v60 }
0x26a3   :  { %4224 = vmatprep.subr.bf16.mxu0 %v4482_v11 }
0x26a5   :  { %3929 = vmatmul.mubr.msk.f32.gmra.mrb[26].mxu0 %vm51_vm0, %v1942_v7 }
0x26a6   :  { %3931 = vmatprep.mubr.msk.f32.mxu0 %vm51_vm0, %v1943_v25  ;;  %4226 = vmatpush3.bf16.msra.mxu0 %v4954_v4 }
0x26a7   :  { %4233 = vmatprep.subr.bf16.mxu0 %v4482_v11 }
0x26a9   :  { %3932 = vmatmul.mubr.msk.f32.gmra.mrb[28].mxu0 %vm51_vm0, %v1944_v61 }
0x26aa   :  { %3934 = vmatprep.mubr.msk.f32.mxu0 %vm51_vm0, %v1945_v12 }
0x2774   :  { %v3927_v32 = vpop.f32.mrb[24].mxu0 }
0x2775   :  { %v2182_v34 = vpop.f32.mrb[25].mxu0  ;;  %v2229_v16 = vadd.f32 %v3927_v32, %v4998_v30  ;;  %v3425_v32 = vmul.f32 -1.442695, %v4846_v10 }
0x2776   :  { %v2228_v36 = vadd.f32 %v4998_v30, %v2182_v34 }
0x2778   :  { %v2310_v63 = vadd.f32 %v2306_v26, %v2228_v36  ;;  %v5001_v38 = vpop.f32.mrb[26].mxu0 }
0x2779   :  { %v5003_v39 = vpop.f32.mrb[27].mxu0 }
0x277a   :  { %4402 = vtanh.f32 %v2310_v63  ;;  %v3462_v42 = vmul.f32 -1.442695, %v2310_v63  ;;  %v2230_v15 = vadd.f32 %v4998_v30, %v5003_v39 }
0x277c   :  { %v5005_v40 = vpop.f32.mrb[28].mxu0  ;;  %4404 = vpow2.f32 %v3462_v42 }
0x277d   :  { %v5007_v33 = vpop.f32.mrb[29].mxu0 }
0x2784   :  { %v4403_v41 = vpop.eup %4402 }
0x2785   :  { %2320 = vrot.lane.b32.xlu0 %v4403_v41, %s4485_s21 }
0x2786   :  { %v4405_v43 = vpop.eup %4404 }
0x2787   :  { %v2314_v9 = vadd.f32 1.0, %v4405_v43 }
0x2789   :  { %4406 = vrcp.f32 %v2314_v9 }
0x2793   :  { %v4407_v44 = vpop.eup %4406 }
0x2794   :  { %v2318_v47 = vmul.f32 0.0, %v4407_v44 }
0x27f7   :  { %v2321_v45 = vpop.permute.xlu0 %2320 }
0x27f8   :  { %v2323_v46 = vmul.f32 %v4407_v44, %v2321_v45 }
0x27fa   :  { %2325 = vrot.lane.b32.xlu1 %v2323_v46, %s4486_s22 }
0x286c   :  { %v2326_v48 = vpop.permute.xlu1 %2325 }
0x286d   :  { %v2328_v49 = vadd.f32 %v2326_v48, %v2318_v47 }
0x286f   :  { %4408 = vtanh.f32 %v2328_v49 }
0x2879   :  { %v4409_v50 = vpop.eup %4408 }
0x287a   :  { %2331 = vrot.lane.b32.xlu0 %v4409_v50, %s4485_s21 }
0x28ec   :  { %v2332_v51 = vpop.permute.xlu0 %2331 }
0x28ed   :  { %v2334_v1 = vmul.f32 %v4407_v44, %v2332_v51 }
0x28ef   :  { %2336 = vrot.lane.b32.xlu1 %v2334_v1, %s4486_s22 }
0x2961   :  { %v2337_v52 = vpop.permute.xlu1 %2336 }
0x2962   :  { %3957 = vmatmul.mubr.msk.f32.vlgmr.msra.gmra.mrb[26].mxu1 %vm51_vm0, %v2337_v52 }
0x2963   :  { %4211 = vmatpush3.bf16.msra.mxu1 %v4944_v60  ;;  %3967 = vmatprep.mubr.msk.f32.mxu1 %vm4483_vm1, %v4484_v21 }
0x2964   :  { %4212 = vmatprep.subr.bf16.mxu1 %v4482_v11 }
0x2967   :  { %4214 = vmatpush3.bf16.msra.mxu1 %v4954_v4 }
0x2968   :  { %4215 = vmatprep.subr.bf16.mxu1 %v4482_v11 }
0x2a35   :  { %v2406_v53 = vpop.f32.mrb[26].mxu1 }
0x2a36   :  { %v2410_v29 = vadd.f32 %v2406_v53, %v2229_v16  ;;  %v3958_v31 = vpop.f32.mrb[27].mxu1 }
0x2a38   :  { %4410 = vtanh.f32 %v2410_v29  ;;  %v3464_v55 = vmul.f32 -1.442695, %v2410_v29 }
0x2a3a   :  { %4412 = vpow2.f32 %v3464_v55 }
0x2a42   :  { %v4411_v54 = vpop.eup %4410 }
0x2a43   :  { %2420 = vrot.lane.b32.xlu0 %v4411_v54, %s4485_s21 }
0x2a44   :  { %v4413_v56 = vpop.eup %4412 }
0x2a45   :  { %v2414_v3 = vadd.f32 1.0, %v4413_v56 }
0x2a47   :  { %4414 = vrcp.f32 %v2414_v3 }
0x2a51   :  { %v4415_v35 = vpop.eup %4414 }
0x2a52   :  { %v2418_v14 = vmul.f32 %v4415_v35, %v2328_v49  ;;  %v2231_v49 = vadd.f32 %v5001_v38, %v4998_v30 }
0x2ab5   :  { %v2421_v57 = vpop.permute.xlu0 %2420 }
0x2ab6   :  { %v2423_v59 = vmul.f32 %v4415_v35, %v2421_v57 }
0x2ab8   :  { %2425 = vrot.lane.b32.xlu1 %v2423_v59, %s4486_s22 }
0x2b2a   :  { %v2426_v62 = vpop.permute.xlu1 %2425 }
0x2b2b   :  { %v2428_v2 = vadd.f32 %v2426_v62, %v2418_v14 }
0x2b2d   :  { %4416 = vtanh.f32 %v2428_v2 }
0x2b37   :  { %v4417_v58 = vpop.eup %4416 }
0x2b38   :  { %2431 = vrot.lane.b32.xlu0 %v4417_v58, %s4485_s21 }
0x2baa   :  { %v2432_v6 = vpop.permute.xlu0 %2431 }
0x2bab   :  { %v2434_v8 = vmul.f32 %v4415_v35, %v2432_v6  ;;  %v2232_v6 = vadd.f32 %v4998_v30, %v5007_v33 }
0x2bad   :  { %2436 = vrot.lane.b32.xlu1 %v2434_v8, %s4486_s22 }
0x2c1f   :  { %v2437_v13 = vpop.permute.xlu1 %2436 }
0x2c20   :  { %3968 = vmatmul.mubr.msk.f32.vlgmr.msra.gmra.mrb[28].mxu1 %vm51_vm0, %v2437_v13 }
0x2c21   :  { %4217 = vmatpush3.bf16.msra.mxu1 %v4944_v60  ;;  %3978 = vmatprep.mubr.msk.f32.mxu1 %vm4483_vm1, %v4484_v21 }
0x2c22   :  { %4218 = vmatprep.subr.bf16.mxu1 %v4482_v11 }
0x2c25   :  { %4220 = vmatpush3.bf16.msra.mxu1 %v4954_v4 }
0x2c26   :  { %4227 = vmatprep.subr.bf16.mxu1 %v4482_v11 }
0x2cf3   :  { %v2506_v0 = vpop.f32.mrb[28].mxu1 }
0x2cf4   :  { %v2510_v17 = vadd.f32 %v2506_v0, %v2230_v15  ;;  %v3969_v27 = vpop.f32.mrb[29].mxu1 }
0x2cf6   :  { %4418 = vtanh.f32 %v2510_v17  ;;  %v3466_v18 = vmul.f32 -1.442695, %v2510_v17 }
0x2cf8   :  { %4420 = vpow2.f32 %v3466_v18 }
0x2d00   :  { %v4419_v5 = vpop.eup %4418 }
0x2d01   :  { %2520 = vrot.lane.b32.xlu0 %v4419_v5, %s4485_s21 }
0x2d02   :  { %v4421_v19 = vpop.eup %4420 }
0x2d03   :  { %v2514_v37 = vadd.f32 1.0, %v4421_v19 }
0x2d05   :  { %4422 = vrcp.f32 %v2514_v37 }
0x2d0f   :  { %v4423_v22 = vpop.eup %4422 }
0x2d10   :  { %v2518_v25 = vmul.f32 %v4423_v22, %v2428_v2 }
0x2d73   :  { %v2521_v23 = vpop.permute.xlu0 %2520 }
0x2d74   :  { %v2523_v7 = vmul.f32 %v4423_v22, %v2521_v23 }
0x2d76   :  { %2525 = vrot.lane.b32.xlu1 %v2523_v7, %s4486_s22 }
0x2de8   :  { %v2526_v61 = vpop.permute.xlu1 %2525 }
0x2de9   :  { %v2528_v12 = vadd.f32 %v2526_v61, %v2518_v25 }
0x2deb   :  { %4424 = vtanh.f32 %v2528_v12 }
0x2dec   :  { %4426 = vtanh.f32 %v4846_v10 }
0x2ded   :  { %4428 = vpow2.f32 %v3425_v32 }
0x2df5   :  { %v4425_v26 = vpop.eup %4424 }
0x2df6   :  { %2531 = vrot.lane.b32.xlu0 %v4425_v26, %s4485_s21  ;;  %v4427_v28 = vpop.eup %4426  ;;  %v2233_v26 = vadd.f32 %v5005_v40, %v4998_v30 }
0x2df7   :  { %v4429_v34 = vpop.eup %4428 }
0x2df8   :  { %v1094_v36 = vadd.f32 1.0, %v4429_v34 }
0x2dfa   :  { %1100 = vrot.lane.b32.xlu0 %v4427_v28, %s4485_s21  ;;  %4430 = vrcp.f32 %v1094_v36 }
0x2e04   :  { %v4431_v41 = vpop.eup %4430 }
0x2e05   :  { %v1098_v10 = vmul.f32 %v4431_v41, %v4822_v24 }
0x2e68   :  { %v2532_v63 = vpop.permute.xlu0 %2531 }
0x2e69   :  { %v2534_v39 = vmul.f32 %v4423_v22, %v2532_v63 }
0x2e6b   :  { %2536 = vrot.lane.b32.xlu1 %v2534_v39, %s4486_s22 }
0x2e6c   :  { %v1101_v42 = vpop.permute.xlu0 %1100 }
0x2e6d   :  { %v1103_v43 = vmul.f32 %v4431_v41, %v1101_v42 }
0x2e6f   :  { %1105 = vrot.lane.b32.xlu0 %v1103_v43, %s4486_s22 }
0x2edd   :  { %v2537_v9 = vpop.permute.xlu1 %2536 }
0x2ede   :  { %3979 = vmatmul.mubr.msk.f32.vlgmr.msra.gmra.mrb[30].mxu1 %vm51_vm0, %v2537_v9 }
0x2edf   :  { %4229 = vmatpush3.bf16.msra.mxu1 %v4944_v60  ;;  %4000 = vmatprep.mubr.msk.f32.mxu1 %vm4483_vm1, %v4484_v21 }
0x2ee0   :  { %4230 = vmatprep.subr.bf16.mxu1 %v4482_v11 }
0x2ee1   :  { %v1106_v44 = vpop.permute.xlu0 %1105 }
0x2ee2   :  { %v1108_v45 = vadd.f32 %v1106_v44, %v1098_v10 }
0x2ee3   :  { %4232 = vmatpush3.bf16.msra.mxu1 %v4954_v4 }
0x2ee4   :  { %4432 = vtanh.f32 %v1108_v45  ;;  %4239 = vmatprep.subr.bf16.mxu1 %v4482_v11 }
0x2eee   :  { %v4433_v46 = vpop.eup %4432 }
0x2eef   :  { %1111 = vrot.lane.b32.xlu0 %v4433_v46, %s4485_s21  ;;  %v3481_v46 = vld [vmem:[%s5194_s4 + $0x60] sm:$0xff] }
0x2f61   :  { %v1112_v47 = vpop.permute.xlu0 %1111 }
0x2f62   :  { %v1114_v48 = vmul.f32 %v4431_v41, %v1112_v47  ;;  %v3482_v47 = vld [vmem:[%s5194_s4 + $0x68] sm:$0xff] }
0x2f64   :  { %1116 = vrot.lane.b32.xlu0 %v1114_v48, %s4486_s22  ;;  %v4246_v48 = vpack.c.bf16 %v3482_v47, %v3481_v46  ;;  %v3217_v46 = vld [vmem:[%s5197_s7] sm:$0xff]  ;;  %v3218_v47 = vld [vmem:[%s5197_s7 + $0x8] sm:$0xff] }
0x2fb1   :  { %v2606_v24 = vpop.f32.mrb[30].mxu1 }
0x2fb2   :  { %v2610_v50 = vadd.f32 %v2606_v24, %v2231_v49  ;;  %v3980_v51 = vpop.f32.mrb[31].mxu1  ;;  %v3483_v49 = vld [vmem:[%s5194_s4 + $0x70] sm:$0xff]  ;;  %v3484_v24 = vld [vmem:[%s5194_s4 + $0x78] sm:$0xff] }
0x2fb3   :  { %v4249_v51 = vpack.c.bf16 %v3484_v24, %v3483_v49  ;;  %v4264_v49 = vpack.c.bf16 %v3218_v47, %v3217_v46  ;;  %v3220_v24 = vld [vmem:[%s5197_s7 + $0x18] sm:$0xff] }
0x2fb4   :  { %4434 = vtanh.f32 %v2610_v50  ;;  %v3468_v53 = vmul.f32 -1.442695, %v2610_v50 }
0x2fb6   :  { %4436 = vpow2.f32 %v3468_v53 }
0x2fbe   :  { %v4435_v1 = vpop.eup %4434 }
0x2fbf   :  { %2620 = vrot.lane.b32.xlu1 %v4435_v1, %s4485_s21 }
0x2fc0   :  { %v4437_v38 = vpop.eup %4436 }
0x2fc1   :  { %v2614_v29 = vadd.f32 1.0, %v4437_v38 }
0x2fc3   :  { %4438 = vrcp.f32 %v2614_v29 }
0x2fcd   :  { %v4439_v31 = vpop.eup %4438 }
0x2fce   :  { %v2618_v56 = vmul.f32 %v4439_v31, %v2528_v12 }
0x2fd6   :  { %v1117_v52 = vpop.permute.xlu0 %1116 }
0x2fd7   :  { %1119 = vst.msk [vmem:[#allocation2 + $0x38] sm:$0xff] %vm51_vm0, %v1117_v52 }
0x2fde   :  { %v5056_v16 = vld [vmem:[#allocation2 + $0x38] sm:$0xff] }
0x2fdf   :  { %3935 = vmatmul.mubr.msk.f32.gmra.mrb[30].mxu0 %vm51_vm0, %v5056_v16 }
0x2fe0   :  { %3989 = vmatprep.mubr.msk.f32.mxu0 %vm4483_vm1, %v4484_v21 }
0x3031   :  { %v2621_v54 = vpop.permute.xlu1 %2620 }
0x3032   :  { %v2623_v55 = vmul.f32 %v4439_v31, %v2621_v54 }
0x3034   :  { %2625 = vrot.lane.b32.xlu1 %v2623_v55, %s4486_s22 }
0x30a6   :  { %v2626_v3 = vpop.permute.xlu1 %2625 }
0x30a7   :  { %v2628_v35 = vadd.f32 %v2626_v3, %v2618_v56 }
0x30a9   :  { %4440 = vtanh.f32 %v2628_v35 }
0x30b2   :  { %v5063_v57 = vpop.f32.mrb[30].mxu0 }
0x30b3   :  { %v4441_v59 = vpop.eup %4440  ;;  %v5065_v14 = vpop.f32.mrb[31].mxu0 }
0x30b4   :  { %2631 = vrot.lane.b32.xlu1 %v4441_v59, %s4485_s21  ;;  %v2234_v1 = vadd.f32 %v4998_v30, %v5065_v14 }
0x3126   :  { %v2632_v62 = vpop.permute.xlu1 %2631 }
0x3127   :  { %v2634_v2 = vmul.f32 %v4439_v31, %v2632_v62 }
0x3129   :  { %2636 = vrot.lane.b32.xlu1 %v2634_v2, %s4486_s22 }
0x319b   :  { %v2637_v58 = vpop.permute.xlu1 %2636 }
0x319c   :  { %3990 = vmatmul.mubr.msk.f32.vlgmr.msra.gmra.mrb[32].mxu0 %vm51_vm0, %v2637_v58 }
0x319d   :  { %4235 = vmatpush3.bf16.msra.mxu0 %v4944_v60  ;;  %4011 = vmatprep.mubr.msk.f32.mxu0 %vm4483_vm1, %v4484_v21 }
0x319e   :  { %4236 = vmatprep.subr.bf16.mxu0 %v4482_v11 }
0x31a1   :  { %4238 = vmatpush3.bf16.msra.mxu0 %v4954_v4 }
0x31a2   :  { %4245 = vmatprep.subr.bf16.mxu0 %v4482_v11 }
0x326f   :  { %v2706_v8 = vpop.f32.mrb[32].mxu0 }
0x3270   :  { %v2710_v13 = vadd.f32 %v2706_v8, %v2232_v6  ;;  %v3991_v15 = vpop.f32.mrb[33].mxu0 }
0x3271   :  { %v3478_v15 = vld [vmem:[%s5194_s4 + $0x48] sm:$0xff] }
0x3272   :  { %4442 = vtanh.f32 %v2710_v13  ;;  %v3470_v17 = vmul.f32 -1.442695, %v2710_v13  ;;  %v3477_v13 = vld [vmem:[%s5194_s4 + $0x40] sm:$0xff] }
0x3274   :  { %4444 = vpow2.f32 %v3470_v17  ;;  %v3479_v17 = vld [vmem:[%s5194_s4 + $0x50] sm:$0xff] }
0x327c   :  { %v4443_v0 = vpop.eup %4442 }
0x327d   :  { %2720 = vrot.lane.b32.xlu0 %v4443_v0, %s4485_s21  ;;  %v4252_v0 = vpack.c.bf16 %v3478_v15, %v3477_v13 }
0x327e   :  { %v4445_v27 = vpop.eup %4444 }
0x327f   :  { %v2714_v5 = vadd.f32 1.0, %v4445_v27  ;;  %v3480_v27 = vld [vmem:[%s5194_s4 + $0x58] sm:$0xff] }
0x3281   :  { %4446 = vrcp.f32 %v2714_v5 }
0x328b   :  { %v4447_v18 = vpop.eup %4446 }
0x328c   :  { %v2718_v22 = vmul.f32 %v4447_v18, %v2628_v35 }
0x32ef   :  { %v2721_v19 = vpop.permute.xlu0 %2720 }
0x32f0   :  { %v2723_v37 = vmul.f32 %v4447_v18, %v2721_v19  ;;  %v2235_v19 = vadd.f32 %v5063_v57, %v4998_v30 }
0x32f2   :  { %2725 = vrot.lane.b32.xlu1 %v2723_v37, %s4486_s22 }
0x3364   :  { %v2726_v23 = vpop.permute.xlu1 %2725 }
0x3365   :  { %v2728_v33 = vadd.f32 %v2726_v23, %v2718_v22 }
0x3367   :  { %4448 = vtanh.f32 %v2728_v33 }
0x3371   :  { %v4449_v7 = vpop.eup %4448 }
0x3372   :  { %2731 = vrot.lane.b32.xlu0 %v4449_v7, %s4485_s21  ;;  %v3488_v7 = vld [vmem:[%s5196_s6 + $0x1] ss:$0 sm:$0xff] }
0x33e4   :  { %v2732_v25 = vpop.permute.xlu0 %2731 }
0x33e5   :  { %v2734_v61 = vmul.f32 %v4447_v18, %v2732_v25  ;;  %v4255_v18 = vpack.c.bf16 %v3480_v27, %v3479_v17 }
0x33e7   :  { %2736 = vrot.lane.b32.xlu1 %v2734_v61, %s4486_s22 }
0x3459   :  { %v2737_v12 = vpop.permute.xlu1 %2736 }
0x345a   :  { %4001 = vmatmul.mubr.msk.f32.vlgmr.msra.gmra.mrb[32].mxu1 %vm51_vm0, %v2737_v12 }
0x345b   :  { %4241 = vmatpush3.bf16.msra.mxu1 %v4944_v60  ;;  %4022 = vmatprep.mubr.msk.f32.mxu1 %vm4483_vm1, %v4484_v21 }
0x345c   :  { %4242 = vmatprep.subr.bf16.mxu1 %v4482_v11 }
0x345f   :  { %4244 = vmatpush3.bf16.msra.mxu1 %v4954_v4 }
0x3460   :  { %4251 = vmatprep.subr.bf16.mxu1 %v4482_v11 }
0x352d   :  { %v2806_v28 = vpop.f32.mrb[32].mxu1 }
0x352e   :  { %v2810_v32 = vadd.f32 %v2806_v28, %v2233_v26  ;;  %v4002_v34 = vpop.f32.mrb[33].mxu1 }
0x3530   :  { %4450 = vtanh.f32 %v2810_v32  ;;  %v3472_v60 = vmul.f32 -1.442695, %v2810_v32 }
0x3532   :  { %4452 = vpow2.f32 %v3472_v60 }
0x353a   :  { %v4451_v36 = vpop.eup %4450 }
0x353b   :  { %2820 = vrot.lane.b32.xlu0 %v4451_v36, %s4485_s21 }
0x353c   :  { %v4453_v63 = vpop.eup %4452 }
0x353d   :  { %v2814_v39 = vadd.f32 1.0, %v4453_v63 }
0x353f   :  { %4454 = vrcp.f32 %v2814_v39 }
0x3549   :  { %v4455_v41 = vpop.eup %4454 }
0x354a   :  { %v2818_v43 = vmul.f32 %v4455_v41, %v2728_v33 }
0x35ad   :  { %v2821_v42 = vpop.permute.xlu0 %2820 }
0x35ae   :  { %v2823_v4 = vmul.f32 %v4455_v41, %v2821_v42 }
0x35b0   :  { %2825 = vrot.lane.b32.xlu1 %v2823_v4, %s4486_s22 }
0x3622   :  { %v2826_v9 = vpop.permute.xlu1 %2825 }
0x3623   :  { %v2828_v40 = vadd.f32 %v2826_v9, %v2818_v43 }
0x3625   :  { %4456 = vtanh.f32 %v2828_v40 }
0x362f   :  { %v4457_v10 = vpop.eup %4456 }
0x3630   :  { %2831 = vrot.lane.b32.xlu0 %v4457_v10, %s4485_s21 }
0x36a2   :  { %v2832_v44 = vpop.permute.xlu0 %2831 }
0x36a3   :  { %v2834_v45 = vmul.f32 %v4455_v41, %v2832_v44 }
0x36a5   :  { %2836 = vrot.lane.b32.xlu1 %v2834_v45, %s4486_s22 }
0x3717   :  { %v2837_v50 = vpop.permute.xlu1 %2836 }
0x3718   :  { %4012 = vmatmul.mubr.msk.f32.vlgmr.msra.gmra.mrb[34].mxu0 %vm51_vm0, %v2837_v50 }
0x3719   :  { %4247 = vmatpush3.bf16.msra.mxu0 %v4246_v48  ;;  %4033 = vmatprep.mubr.msk.f32.mxu0 %vm4483_vm1, %v4484_v21  ;;  %v3219_v48 = vld [vmem:[%s5197_s7 + $0x10] sm:$0xff] }
0x371a   :  { %4248 = vmatprep.subr.bf16.mxu0 %v4482_v11  ;;  %v4267_v50 = vpack.c.bf16 %v3220_v24, %v3219_v48 }
0x371d   :  { %4250 = vmatpush3.bf16.msra.mxu0 %v4249_v51 }
0x371e   :  { %4257 = vmatprep.subr.bf16.mxu0 %v4482_v11 }
0x3720   :  { %4034 = vmatmul.mubr.msk.f32.vlgmr.msra.gmra.mrb[36].mxu0 %vm51_vm0, %v4980_v20 }
0x3721   :  { %4055 = vmatprep.mubr.msk.f32.mxu0 %vm4483_vm1, %v4484_v21 }
0x37eb   :  { %v2906_v52 = vpop.f32.mrb[34].mxu0 }
0x37ec   :  { %v2910_v53 = vadd.f32 %v2906_v52, %v2234_v1  ;;  %v4013_v38 = vpop.f32.mrb[35].mxu0  ;;  %v3221_v1 = vld [vmem:[%s5197_s7 + $0x20] sm:$0xff]  ;;  %v3222_v52 = vld [vmem:[%s5197_s7 + $0x28] sm:$0xff] }
0x37ed   :  { %v4258_v38 = vpack.c.bf16 %v3222_v52, %v3221_v1 }
0x37ee   :  { %4458 = vtanh.f32 %v2910_v53  ;;  %v3474_v55 = vmul.f32 -1.442695, %v2910_v53  ;;  %v3223_v53 = vld [vmem:[%s5197_s7 + $0x30] sm:$0xff] }
0x37ef   :  { %4259 = vmatpush3.bf16.msra.mxu0 %v4258_v38 }
0x37f0   :  { %4460 = vpow2.f32 %v3474_v55  ;;  %4260 = vmatprep.subr.bf16.mxu0 %v4482_v11 }
0x37f3   :  { %v3110_v29 = vpop.f32.mrb[36].mxu0 }
0x37f4   :  { %v4035_v31 = vpop.f32.mrb[37].mxu0 }
0x37f8   :  { %v4459_v54 = vpop.eup %4458 }
0x37f9   :  { %2920 = vrot.lane.b32.xlu0 %v4459_v54, %s4485_s21 }
0x37fa   :  { %v4461_v56 = vpop.eup %4460 }
0x37fb   :  { %v2914_v3 = vadd.f32 1.0, %v4461_v56 }
0x37fd   :  { %4462 = vrcp.f32 %v2914_v3 }
0x3807   :  { %v4463_v20 = vpop.eup %4462 }
0x3808   :  { %v2918_v14 = vmul.f32 %v4463_v20, %v2828_v40 }
0x386b   :  { %v2921_v35 = vpop.permute.xlu0 %2920 }
0x386c   :  { %v2923_v59 = vmul.f32 %v4463_v20, %v2921_v35 }
0x386e   :  { %2925 = vrot.lane.b32.xlu1 %v2923_v59, %s4486_s22 }
0x38e0   :  { %v2926_v62 = vpop.permute.xlu1 %2925 }
0x38e1   :  { %v2928_v2 = vadd.f32 %v2926_v62, %v2918_v14 }
0x38e3   :  { %4464 = vtanh.f32 %v2928_v2 }
0x38ed   :  { %v4465_v58 = vpop.eup %4464 }
0x38ee   :  { %2931 = vrot.lane.b32.xlu0 %v4465_v58, %s4485_s21 }
0x3960   :  { %v2932_v6 = vpop.permute.xlu0 %2931 }
0x3961   :  { %v2934_v8 = vmul.f32 %v4463_v20, %v2932_v6 }
0x3963   :  { %2936 = vrot.lane.b32.xlu1 %v2934_v8, %s4486_s22 }
0x39d5   :  { %v2937_v5 = vpop.permute.xlu1 %2936 }
0x39d6   :  { %4023 = vmatmul.mubr.msk.f32.vlgmr.msra.gmra.mrb[34].mxu1 %vm51_vm0, %v2937_v5 }
0x39d7   :  { %4253 = vmatpush3.bf16.msra.mxu1 %v4252_v0  ;;  %4044 = vmatprep.mubr.msk.f32.mxu1 %vm4483_vm1, %v4484_v21 }
0x39d8   :  { %4254 = vmatprep.subr.bf16.mxu1 %v4482_v11 }
0x39db   :  { %4256 = vmatpush3.bf16.msra.mxu1 %v4255_v18 }
0x39dc   :  { %4263 = vmatprep.subr.bf16.mxu1 %v4482_v11 }
0x39de   :  { %4045 = vmatmul.mubr.msk.f32.vlgmr.msra.gmra.mrb[36].mxu1 %vm51_vm0, %v5056_v16 }
0x39df   :  { %4066 = vmatprep.mubr.msk.f32.mxu1 %vm4483_vm1, %v4484_v21  ;;  %4265 = vmatpush3.bf16.msra.mxu1 %v4264_v49 }
0x39e0   :  { %4266 = vmatprep.subr.bf16.mxu1 %v4482_v11  ;;  %v3492_v11 = vld [vmem:[%s5198_s8] ss:$0 sm:$0xff] }
0x39e3   :  { %4268 = vmatpush3.bf16.msra.mxu1 %v4267_v50 }
0x3aa9   :  { %v3006_v37 = vpop.f32.mrb[34].mxu1 }
0x3aaa   :  { %v3010_v22 = vadd.f32 %v3006_v37, %v2235_v19  ;;  %v4024_v23 = vpop.f32.mrb[35].mxu1 }
0x3aac   :  { %4466 = vtanh.f32 %v3010_v22  ;;  %v3476_v30 = vmul.f32 -1.442695, %v3010_v22 }
0x3ab1   :  { %v3180_v33 = vpop.f32.mrb[36].mxu1 }
0x3ab2   :  { %v3181_v25 = vadd.f32 %v3180_v33, %v3110_v29  ;;  %v4046_v61 = vpop.f32.mrb[37].mxu1  ;;  %v3224_v29 = vld [vmem:[%s5197_s7 + $0x38] sm:$0xff] }
0x3ab3   :  { %v4261_v31 = vpack.c.bf16 %v3224_v29, %v3223_v53 }
0x3ab4   :  { %v3192_v12 = vadd.f32 %v3488_v7, %v3181_v25 }
0x3ab5   :  { %4262 = vmatpush3.bf16.msra.mxu0 %v4261_v31 }
0x3ab6   :  { %v4467_v26 = vpop.eup %4466  ;;  %4468 = vtanh.f32 %v3192_v12  ;;  %v3489_v16 = vmul.f32 -1.442695, %v3192_v12 }
0x3ab7   :  { %3020 = vrot.lane.b32.xlu0 %v4467_v26, %s4485_s21  ;;  %4470 = vpow2.f32 %v3476_v30 }
0x3ab8   :  { %4472 = vpow2.f32 %v3489_v16 }
0x3ac0   :  { %v4469_v21 = vpop.eup %4468 }
0x3ac1   :  { %3202 = vrot.lane.b32.xlu1 %v4469_v21, %s4485_s21  ;;  %v4471_v57 = vpop.eup %4470 }
0x3ac2   :  { %v3014_v28 = vadd.f32 1.0, %v4471_v57  ;;  %v4473_v32 = vpop.eup %4472 }
0x3ac3   :  { %v3196_v34 = vadd.f32 1.0, %v4473_v32 }
0x3ac4   :  { %4474 = vrcp.f32 %v3014_v28 }
0x3ac5   :  { %4476 = vrcp.f32 %v3196_v34 }
0x3ace   :  { %v4475_v36 = vpop.eup %4474 }
0x3acf   :  { %v4477_v39 = vpop.eup %4476  ;;  %v3018_v4 = vmul.f32 %v4475_v36, %v2928_v2 }
0x3ad0   :  { %v3200_v40 = vmul.f32 0.0, %v4477_v39 }
0x3b29   :  { %v3021_v60 = vpop.permute.xlu0 %3020 }
0x3b2a   :  { %v3023_v63 = vmul.f32 %v4475_v36, %v3021_v60 }
0x3b2c   :  { %3025 = vrot.lane.b32.xlu0 %v3023_v63, %s4486_s22 }
0x3b33   :  { %v3203_v41 = vpop.permute.xlu1 %3202 }
0x3b34   :  { %v3205_v42 = vmul.f32 %v4477_v39, %v3203_v41 }
0x3b36   :  { %3207 = vrot.lane.b32.xlu1 %v3205_v42, %s4486_s22 }
0x3b9e   :  { %v3026_v43 = vpop.permute.xlu0 %3025 }
0x3b9f   :  { %v3028_v9 = vadd.f32 %v3026_v43, %v3018_v4 }
0x3ba1   :  { %4478 = vtanh.f32 %v3028_v9 }
0x3ba8   :  { %v3208_v10 = vpop.permute.xlu1 %3207 }
0x3ba9   :  { %v3210_v44 = vadd.f32 %v3208_v10, %v3200_v40 }
0x3bab   :  { %v4479_v45 = vpop.eup %4478  ;;  %4480 = vtanh.f32 %v3210_v44 }
0x3bac   :  { %3031 = vrot.lane.b32.xlu0 %v4479_v45, %s4485_s21 }
0x3bb5   :  { %v4481_v51 = vpop.eup %4480 }
0x3bb6   :  { %3213 = vrot.lane.b32.xlu1 %v4481_v51, %s4485_s21 }
0x3c1e   :  { %v3032_v54 = vpop.permute.xlu0 %3031 }
0x3c1f   :  { %v3034_v55 = vmul.f32 %v4475_v36, %v3032_v54 }
0x3c21   :  { %3301 = vrot.lane.b32.xlu1 %v3034_v55, %s4486_s22 }
0x3c28   :  { %v3214_v56 = vpop.permute.xlu1 %3213 }
0x3c29   :  { %v3216_v3 = vmul.f32 %v4477_v39, %v3214_v56 }
0x3c2b   :  { %3226 = vrot.lane.b32.xlu0 %v3216_v3, %s4486_s22 }
0x3c93   :  { %v3302_v20 = vpop.permute.xlu1 %3301 }
0x3c94   :  { %4067 = vmatmul.mubr.msk.f32.vlgmr.msra.gmra.mrb[38].mxu1 %vm51_vm0, %v3302_v20 }
0x3c9d   :  { %v3227_v35 = vpop.permute.xlu0 %3226 }
0x3c9e   :  { %4056 = vmatmul.mubr.msk.f32.vlgmr.msra.gmra.mrb[38].mxu0 %vm51_vm0, %v3227_v35 }
0x3d67   :  { %v3371_v59 = vpop.f32.mrb[38].mxu1 }
0x3d68   :  { %v4068_v14 = vpop.f32.mrb[39].mxu1 }
0x3d71   :  { %v3296_v62 = vpop.f32.mrb[38].mxu0 }
0x3d72   :  { %v3372_v2 = vadd.f32 %v3371_v59, %v3296_v62  ;;  %v4057_v58 = vpop.f32.mrb[39].mxu0 }
0x3d74   :  { %v3382_v6 = vadd.f32 %v3492_v11, %v3372_v2 }
0x3d76   :  { %3383 = vst [vmem:[%s5199_s9] sm:$0xff] %v3382_v6 }

</bundles_post_ra>
